<compile_context>
chip_gen: v7x
topology: tpu7x:2x2x1
jax: 0.10.0
libtpu: 0.0.40
codegen_flags: <defaults>
</compile_context>

<pallas_src>
import math

import jax
import jax.numpy as jnp
from jax import lax
from jax.experimental import pallas as pl
from jax.experimental.pallas import tpu as pltpu

DEFAULT_TEMPERATURE = 0.1


def _make_supcon_kernel(n_valid, tq, tk, inv_temp, mm_dtype):
    """Build the tiled SupCon kernel with static config baked in as Python constants."""

    def kernel(featq_ref, featkT_ref, labq_ref, labk_ref, out_ref,
               rowq_cache, pos_sum, pos_cnt, denom):
        qi = pl.program_id(0)
        ki = pl.program_id(1)
        row0 = qi * tq
        col0 = ki * tk

        @pl.when(ki == 0)
        def _init():
            pos_sum[...] = jnp.zeros_like(pos_sum)
            pos_cnt[...] = jnp.zeros_like(pos_cnt)
            denom[...] = jnp.zeros_like(denom)
            # L2-normalize the row tile ONCE per row tile (EUP rsqrt) and fold the
            # 1/T softmax temperature in, so the MXU output is already the logits.
            xq = featq_ref[...]                                            # (tq, D) f32
            inv_nq = lax.rsqrt(
                jnp.maximum(jnp.sum(xq * xq, axis=1, keepdims=True), 1e-24))
            rowq_cache[...] = (xq * (inv_nq * inv_temp)).astype(mm_dtype)  # (tq, D)

        # Column tile L2 normalization (recompute cost ~1/tq of the matmul; fine).
        xkT = featkT_ref[...]                                              # (D, tk) f32
        inv_nk = lax.rsqrt(
            jnp.maximum(jnp.sum(xkT * xkT, axis=0, keepdims=True), 1e-24))
        xnkT = (xkT * inv_nk).astype(mm_dtype)                             # (D, tk)

        # Logits tile straight off the MXU (f32 accumulation).
        logits = lax.dot_general(rowq_cache[...], xnkT, (((1,), (0,)), ((), ())),
                                 preferred_element_type=jnp.float32)      # (tq, tk)

        # logits - rowmax: for L2-normalized rows the row max is the diagonal 1/T,
        # and log-softmax is shift invariant, so a constant shift is exact & stable.
        shifted = logits - inv_temp                                        # <= ~0
        e = jnp.exp(shifted)                                               # EUP
        pos_eq = labq_ref[...] == labk_ref[...]                            # (tq, tk) bool

        # Only tiles touching the diagonal or the padded tail need the iota masks;
        # interior tiles take the cheap unmasked path.
        diag_overlap = jnp.logical_and(row0 < col0 + tk, col0 < row0 + tq)
        has_pad_cols = col0 + tk > n_valid
        needs_mask = jnp.logical_or(diag_overlap, has_pad_cols)

        @pl.when(needs_mask)
        def _edge_tile():
            row_g = row0 + lax.broadcasted_iota(jnp.int32, (tq, tk), 0)
            col_g = col0 + lax.broadcasted_iota(jnp.int32, (tq, tk), 1)
            dmask = jnp.logical_and(row_g != col_g, col_g < n_valid)
            denom[...] += jnp.sum(jnp.where(dmask, e, 0.0), axis=1, keepdims=True)
            pmask = jnp.logical_and(pos_eq, dmask)
            pos_sum[...] += jnp.sum(jnp.where(pmask, shifted, 0.0), axis=1, keepdims=True)
            pos_cnt[...] += jnp.sum(pmask.astype(jnp.float32), axis=1, keepdims=True)

        @pl.when(jnp.logical_not(needs_mask))
        def _interior_tile():
            denom[...] += jnp.sum(e, axis=1, keepdims=True)
            pos_sum[...] += jnp.sum(jnp.where(pos_eq, shifted, 0.0), axis=1, keepdims=True)
            pos_cnt[...] += jnp.sum(pos_eq.astype(jnp.float32), axis=1, keepdims=True)

        @pl.when(ki == pl.num_programs(1) - 1)
        def _finalize():
            cnt = pos_cnt[...]
            safe_cnt = jnp.where(cnt < 1e-6, 1.0, cnt)
            # mean_j pos*(shifted - log denom) = (pos_sum - cnt*log(denom)) / cnt
            mlpp = (pos_sum[...]
                    - cnt * jnp.log(jnp.maximum(denom[...], 1e-30))) / safe_cnt
            row_idx = row0 + lax.broadcasted_iota(jnp.int32, (tq, 1), 0)
            mlpp = jnp.where(row_idx < n_valid, mlpp, 0.0)                 # zero pad rows
            # Lane-dense (tq, 128) store: single unmasked full-lane vst per row tile.
            out_ref[...] = jnp.broadcast_to(mlpp, (tq, 128))

    return kernel


def _pick_tile(n, d):
    """Biggest square tile that keeps padding and the VMEM working set reasonable."""
    t = 512
    while t > 128 and n < 2 * t:
        t //= 2
    while t > 128:
        # row feats (dbuf, f32) + col feats (dbuf, f32) + bf16 row cache + out (dbuf)
        # + generous allowance for (t, t) f32 intermediates.
        est = 4 * t * d * 4 + t * d * 2 + 2 * t * 128 * 4 + 12 * t * t * 4
        if est <= 20 * 1024 * 1024:
            break
        t //= 2
    return t


def supervised_contrastive_loss(feature_vectors, labels,
                                temperature=DEFAULT_TEMPERATURE, *,
                                tq=None, tk=None, matmul_dtype=jnp.bfloat16):
    """feature_vectors: [N, D] float, labels: [N] or [N, 1] int -> scalar loss."""
    n, d = feature_vectors.shape
    feats = feature_vectors.astype(jnp.float32)
    labels = jnp.reshape(labels, (-1,)).astype(jnp.int32)   # torch.squeeze equivalent

    if tq is None or tk is None:
        t = _pick_tile(n, d)
        tq = t if tq is None else tq
        tk = t if tk is None else tk

    # TODO(synk): for N below ~128 a plain-XLA fallback would beat the Pallas launch
    # overhead; kept on the Pallas path here so the kernel is always exercised.
    # TODO(synk): D is kept whole next to the (tq, tk) tiles in VMEM (no K tiling).

    tile = math.lcm(tq, tk)
    n_pad = ((n + tile - 1) // tile) * tile

    feats_p = jnp.zeros((n_pad, d), jnp.float32).at[:n].set(feats)
    labels_p = jnp.zeros((n_pad,), jnp.int32).at[:n].set(labels)

    feats_t = feats_p.T                          # (d, n_pad): pre-transposed RHS (no in-kernel xpose)
    lab_rows = labels_p.reshape(n_pad, 1)        # sublane labels for the row tile
    lab_cols = labels_p.reshape(1, n_pad)        # lane-dense labels for the column tile

    grid = (n_pad // tq, n_pad // tk)
    kernel = _make_supcon_kernel(n, tq, tk, 1.0 / float(temperature), matmul_dtype)

    per_row = pl.pallas_call(
        kernel,
        out_shape=jax.ShapeDtypeStruct((n_pad, 128), jnp.float32),
        grid_spec=pltpu.PrefetchScalarGridSpec(
            num_scalar_prefetch=0,
            grid=grid,
            in_specs=[
                pl.BlockSpec((tq, d), lambda qi, ki: (qi, 0)),   # row features
                pl.BlockSpec((d, tk), lambda qi, ki: (0, ki)),   # col features (pre-transposed)
                pl.BlockSpec((tq, 1), lambda qi, ki: (qi, 0)),   # row labels
                pl.BlockSpec((1, tk), lambda qi, ki: (0, ki)),   # col labels (lane-dense)
            ],
            out_specs=pl.BlockSpec((tq, 128), lambda qi, ki: (qi, 0)),
            scratch_shapes=[
                pltpu.VMEM((tq, d), matmul_dtype),      # cached normalized*1/T row tile
                pltpu.VMEM((tq, 1), jnp.float32),       # pos_sum
                pltpu.VMEM((tq, 1), jnp.float32),       # pos_cnt
                pltpu.VMEM((tq, 1), jnp.float32),       # denom
            ],
        ),
        compiler_params=pltpu.CompilerParams(
            dimension_semantics=("parallel", "arbitrary"),
            vmem_limit_bytes=32 * 1024 * 1024,   # explicit so v7x (64 MiB physical) is safe
        ),
    )(feats_p, feats_t, lab_rows, lab_cols)

    # per_row[:, 0] = mean_log_prob_pos per row (padded rows already zeroed in-kernel).
    return -jnp.sum(per_row[:, 0]) / n


def _reference(feature_vectors, labels, temperature=DEFAULT_TEMPERATURE):
    x = feature_vectors.astype(jnp.float32)
    xn = x / jnp.maximum(jnp.linalg.norm(x, axis=1, keepdims=True), 1e-12)
    logits = (xn @ xn.T) / temperature
    labels = jnp.reshape(labels, (-1,))
    n = logits.shape[0]
    same = (labels[:, None] == labels[None, :]).astype(jnp.float32)
    logits_mask = 1.0 - jnp.eye(n, dtype=jnp.float32)
    pos_mask = same * logits_mask
    shifted = logits - jnp.max(logits, axis=1, keepdims=True)
    log_prob = shifted - jnp.log(jnp.sum(jnp.exp(shifted) * logits_mask, axis=1, keepdims=True))
    pos_count = jnp.sum(pos_mask, axis=1)
    pos_count = jnp.where(pos_count < 1e-6, 1.0, pos_count)
    mean_log_prob_pos = jnp.sum(pos_mask * log_prob, axis=1) / pos_count
    return -jnp.mean(mean_log_prob_pos)


if __name__ == "__main__":
    key = jax.random.PRNGKey(0)
    k1, k2, k3, k4 = jax.random.split(key, 4)

    # Small case: single (padded) tile, exercises the edge/masked path.
    N1, D1 = 16, 32
    f1 = jax.random.normal(k1, (N1, D1), dtype=jnp.float32)
    l1 = jax.random.randint(k2, (N1, 1), 0, 4, dtype=jnp.int32)   # 4 classes -> positives exist
    ref1 = _reference(f1, l1)

    loss1_f32 = supervised_contrastive_loss(f1, l1, matmul_dtype=jnp.float32)
    jax.block_until_ready(loss1_f32)
    assert jnp.allclose(loss1_f32, ref1, rtol=5e-3, atol=5e-3), (loss1_f32, ref1)

    loss1_bf16 = supervised_contrastive_loss(f1, l1)
    jax.block_until_ready(loss1_bf16)
    assert jnp.allclose(loss1_bf16, ref1, rtol=5e-2, atol=5e-2), (loss1_bf16, ref1)

    # Larger non-multiple-of-tile case: multi-tile grid, exercises the interior
    # (unmasked) fast path, diagonal tiles, padded rows/columns and accumulation.
    N2, D2 = 300, 64
    f2 = jax.random.normal(k3, (N2, D2), dtype=jnp.float32)
    l2 = jax.random.randint(k4, (N2,), 0, 7, dtype=jnp.int32)
    ref2 = _reference(f2, l2)

    loss2_f32 = supervised_contrastive_loss(f2, l2, matmul_dtype=jnp.float32)
    jax.block_until_ready(loss2_f32)
    assert jnp.allclose(loss2_f32, ref2, rtol=5e-3, atol=5e-3), (loss2_f32, ref2)

    loss2_bf16 = supervised_contrastive_loss(f2, l2)
    jax.block_until_ready(loss2_bf16)
    assert jnp.allclose(loss2_bf16, ref2, rtol=5e-2, atol=5e-2), (loss2_bf16, ref2)

    print("KERNEL_OK")
</pallas_src>

<mosaic_0001>
module attributes {stable_mosaic.version = 11 : i64} {
  func.func @kernel(%arg0: i32, %arg1: i32, %arg2: memref<128x32xf32, #tpu.memory_space<vmem>>, %arg3: memref<32x128xf32, #tpu.memory_space<vmem>>, %arg4: memref<128x1xi32, #tpu.memory_space<vmem>>, %arg5: memref<1x128xi32, #tpu.memory_space<vmem>>, %arg6: memref<128x128xf32, #tpu.memory_space<vmem>>, %arg7: memref<128x32xf32, #tpu.memory_space<vmem>>, %arg8: memref<128x1xf32, #tpu.memory_space<vmem>>, %arg9: memref<128x1xf32, #tpu.memory_space<vmem>>, %arg10: memref<128x1xf32, #tpu.memory_space<vmem>>) attributes {dimension_semantics = [#tpu.dimension_semantics<parallel>, #tpu.dimension_semantics<arbitrary>], iteration_bounds = array<i64: 1, 1>, scalar_prefetch = 0 : i64, scratch_operands = 4 : i64, tpu.core_type = #tpu.core_type<tc>, window_params = [{transform_indices = @transform_0, window_bounds = array<i64: 128, 32>}, {transform_indices = @transform_1, window_bounds = array<i64: 32, 128>}, {transform_indices = @transform_2, window_bounds = array<i64: 128, 1>}, {transform_indices = @transform_3, window_bounds = array<i64: 1, 128>}, {transform_indices = @transform_4, window_bounds = array<i64: 128, 128>}]} {
    %c128_i32 = arith.constant 128 : i32
    %0 = arith.muli %arg0, %c128_i32 : i32
    %c128_i32_0 = arith.constant 128 : i32
    %1 = arith.muli %arg1, %c128_i32_0 : i32
    %c0_i32 = arith.constant 0 : i32
    %2 = arith.cmpi eq, %arg1, %c0_i32 : i32
    %3 = arith.extui %2 : i1 to i32
    %c0_i32_1 = arith.constant 0 : i32
    %4 = arith.cmpi ne, %3, %c0_i32_1 : i32
    scf.if %4 {
      %cst_19 = arith.constant 0.000000e+00 : f32
      %40 = vector.broadcast %cst_19 : f32 to vector<128x1xf32>
      %c0_20 = arith.constant 0 : index
      %c0_21 = arith.constant 0 : index
      %41 = vector.load %arg8[%c0_20, %c0_21] : memref<128x1xf32, #tpu.memory_space<vmem>>, vector<128x1xf32>
      tpu.vector_store %arg8[%c0_20, %c0_21], %40 {strides = array<i32>} : memref<128x1xf32, #tpu.memory_space<vmem>>, vector<128x1xf32>,
      %cst_22 = arith.constant 0.000000e+00 : f32
      %42 = vector.broadcast %cst_22 : f32 to vector<128x1xf32>
      %c0_23 = arith.constant 0 : index
      %c0_24 = arith.constant 0 : index
      %43 = vector.load %arg9[%c0_23, %c0_24] : memref<128x1xf32, #tpu.memory_space<vmem>>, vector<128x1xf32>
      tpu.vector_store %arg9[%c0_23, %c0_24], %42 {strides = array<i32>} : memref<128x1xf32, #tpu.memory_space<vmem>>, vector<128x1xf32>,
      %cst_25 = arith.constant 0.000000e+00 : f32
      %44 = vector.broadcast %cst_25 : f32 to vector<128x1xf32>
      %c0_26 = arith.constant 0 : index
      %c0_27 = arith.constant 0 : index
      %45 = vector.load %arg10[%c0_26, %c0_27] : memref<128x1xf32, #tpu.memory_space<vmem>>, vector<128x1xf32>
      tpu.vector_store %arg10[%c0_26, %c0_27], %44 {strides = array<i32>} : memref<128x1xf32, #tpu.memory_space<vmem>>, vector<128x1xf32>,
      %c0_28 = arith.constant 0 : index
      %c0_29 = arith.constant 0 : index
      %46 = vector.load %arg2[%c0_28, %c0_29] : memref<128x32xf32, #tpu.memory_space<vmem>>, vector<128x32xf32>
      %47 = arith.mulf %46, %46 : vector<128x32xf32>
      %cst_30 = arith.constant dense<0.000000e+00> : vector<128xf32>
      %48 = vector.multi_reduction <add>, %47, %cst_30 [1] : vector<128x32xf32> to vector<128xf32>
      %49 = vector.shape_cast %48 : vector<128xf32> to vector<128x1xf32>
      %cst_31 = arith.constant 1.000000e-24 : f32
      %50 = vector.broadcast %cst_31 : f32 to vector<128x1xf32>
      %51 = arith.maximumf %49, %50 : vector<128x1xf32>
      %52 = math.rsqrt %51 : vector<128x1xf32>
      %cst_32 = arith.constant 1.000000e+01 : f32
      %53 = vector.broadcast %cst_32 : f32 to vector<128x1xf32>
      %54 = arith.mulf %52, %53 : vector<128x1xf32>
      %55 = vector.broadcast %54 : vector<128x1xf32> to vector<128x32xf32>
      %56 = arith.mulf %46, %55 : vector<128x32xf32>
      %c0_33 = arith.constant 0 : index
      %c0_34 = arith.constant 0 : index
      %57 = vector.load %arg7[%c0_33, %c0_34] : memref<128x32xf32, #tpu.memory_space<vmem>>, vector<128x32xf32>
      tpu.vector_store %arg7[%c0_33, %c0_34], %56 {strides = array<i32>} : memref<128x32xf32, #tpu.memory_space<vmem>>, vector<128x32xf32>,
    } else {
    }
    %c0 = arith.constant 0 : index
    %c0_2 = arith.constant 0 : index
    %5 = vector.load %arg3[%c0, %c0_2] : memref<32x128xf32, #tpu.memory_space<vmem>>, vector<32x128xf32>
    %6 = arith.mulf %5, %5 : vector<32x128xf32>
    %cst = arith.constant dense<0.000000e+00> : vector<128xf32>
    %7 = vector.multi_reduction <add>, %6, %cst [0] : vector<32x128xf32> to vector<128xf32>
    %8 = vector.shape_cast %7 : vector<128xf32> to vector<1x128xf32>
    %cst_3 = arith.constant 1.000000e-24 : f32
    %9 = vector.broadcast %cst_3 : f32 to vector<1x128xf32>
    %10 = arith.maximumf %8, %9 : vector<1x128xf32>
    %11 = math.rsqrt %10 : vector<1x128xf32>
    %12 = vector.broadcast %11 : vector<1x128xf32> to vector<32x128xf32>
    %13 = arith.mulf %5, %12 : vector<32x128xf32>
    %c0_4 = arith.constant 0 : index
    %c0_5 = arith.constant 0 : index
    %14 = vector.load %arg7[%c0_4, %c0_5] : memref<128x32xf32, #tpu.memory_space<vmem>>, vector<128x32xf32>
    %cst_6 = arith.constant dense<0.000000e+00> : vector<128x128xf32>
    %15 = tpu.matmul %14, %13, %cst_6 {dimension_numbers = #tpu.dot_dimension_numbers<[1], [0], [0], [1], [0, 0, 1, 1], [], []>} : vector<128x32xf32>, vector<32x128xf32>, vector<128x128xf32> -> vector<128x128xf32>
    %cst_7 = arith.constant 1.000000e+01 : f32
    %16 = vector.broadcast %cst_7 : f32 to vector<128x128xf32>
    %17 = arith.subf %15, %16 : vector<128x128xf32>
    %18 = math.exp %17 : vector<128x128xf32>
    %c0_8 = arith.constant 0 : index
    %c0_9 = arith.constant 0 : index
    %19 = vector.load %arg4[%c0_8, %c0_9] : memref<128x1xi32, #tpu.memory_space<vmem>>, vector<128x1xi32>
    %c0_10 = arith.constant 0 : index
    %c0_11 = arith.constant 0 : index
    %20 = vector.load %arg5[%c0_10, %c0_11] : memref<1x128xi32, #tpu.memory_space<vmem>>, vector<1x128xi32>
    %21 = vector.broadcast %19 : vector<128x1xi32> to vector<128x128xi32>
    %22 = vector.broadcast %20 : vector<1x128xi32> to vector<128x128xi32>
    %23 = arith.cmpi eq, %21, %22 : vector<128x128xi32>
    %c128_i32_12 = arith.constant 128 : i32
    %24 = arith.addi %1, %c128_i32_12 : i32
    %25 = arith.cmpi slt, %0, %24 : i32
    %c128_i32_13 = arith.constant 128 : i32
    %26 = arith.addi %0, %c128_i32_13 : i32
    %27 = arith.cmpi slt, %1, %26 : i32
    %28 = arith.andi %25, %27 : i1
    %c128_i32_14 = arith.constant 128 : i32
    %29 = arith.addi %1, %c128_i32_14 : i32
    %c16_i32 = arith.constant 16 : i32
    %30 = arith.cmpi sgt, %29, %c16_i32 : i32
    %31 = arith.ori %28, %30 : i1
    %32 = arith.extui %31 : i1 to i32
    %c0_i32_15 = arith.constant 0 : i32
    %33 = arith.cmpi ne, %32, %c0_i32_15 : i32
    scf.if %33 {
      %40 = tpu.iota {dimensions = array<i32: 0>} : vector<128x128xi32>
      %41 = vector.broadcast %0 : i32 to vector<128x128xi32>
      %42 = arith.addi %41, %40 : vector<128x128xi32>
      %43 = tpu.iota {dimensions = array<i32: 1>} : vector<128x128xi32>
      %44 = vector.broadcast %1 : i32 to vector<128x128xi32>
      %45 = arith.addi %44, %43 : vector<128x128xi32>
      %46 = arith.cmpi ne, %42, %45 : vector<128x128xi32>
      %c16_i32_19 = arith.constant 16 : i32
      %47 = vector.broadcast %c16_i32_19 : i32 to vector<128x128xi32>
      %48 = arith.cmpi slt, %45, %47 : vector<128x128xi32>
      %49 = arith.andi %46, %48 : vector<128x128xi1>
      %c0_20 = arith.constant 0 : index
      %c0_21 = arith.constant 0 : index
      %50 = vector.load %arg10[%c0_20, %c0_21] : memref<128x1xf32, #tpu.memory_space<vmem>>, vector<128x1xf32>
      %cst_22 = arith.constant 0.000000e+00 : f32
      %51 = vector.broadcast %cst_22 : f32 to vector<128x128xf32>
      %52 = arith.select %49, %18, %51 : vector<128x128xi1>, vector<128x128xf32>
      %cst_23 = arith.constant dense<0.000000e+00> : vector<128xf32>
      %53 = vector.multi_reduction <add>, %52, %cst_23 [1] : vector<128x128xf32> to vector<128xf32>
      %54 = vector.shape_cast %53 : vector<128xf32> to vector<128x1xf32>
      %55 = arith.addf %50, %54 : vector<128x1xf32>
      %c0_24 = arith.constant 0 : index
      %c0_25 = arith.constant 0 : index
      %56 = vector.load %arg10[%c0_24, %c0_25] : memref<128x1xf32, #tpu.memory_space<vmem>>, vector<128x1xf32>
      tpu.vector_store %arg10[%c0_24, %c0_25], %55 {strides = array<i32>} : memref<128x1xf32, #tpu.memory_space<vmem>>, vector<128x1xf32>,
      %57 = arith.andi %23, %49 : vector<128x128xi1>
      %c0_26 = arith.constant 0 : index
      %c0_27 = arith.constant 0 : index
      %58 = vector.load %arg8[%c0_26, %c0_27] : memref<128x1xf32, #tpu.memory_space<vmem>>, vector<128x1xf32>
      %cst_28 = arith.constant 0.000000e+00 : f32
      %59 = vector.broadcast %cst_28 : f32 to vector<128x128xf32>
      %60 = arith.select %57, %17, %59 : vector<128x128xi1>, vector<128x128xf32>
      %cst_29 = arith.constant dense<0.000000e+00> : vector<128xf32>
      %61 = vector.multi_reduction <add>, %60, %cst_29 [1] : vector<128x128xf32> to vector<128xf32>
      %62 = vector.shape_cast %61 : vector<128xf32> to vector<128x1xf32>
      %63 = arith.addf %58, %62 : vector<128x1xf32>
      %c0_30 = arith.constant 0 : index
      %c0_31 = arith.constant 0 : index
      %64 = vector.load %arg8[%c0_30, %c0_31] : memref<128x1xf32, #tpu.memory_space<vmem>>, vector<128x1xf32>
      tpu.vector_store %arg8[%c0_30, %c0_31], %63 {strides = array<i32>} : memref<128x1xf32, #tpu.memory_space<vmem>>, vector<128x1xf32>,
      %c0_32 = arith.constant 0 : index
      %c0_33 = arith.constant 0 : index
      %65 = vector.load %arg9[%c0_32, %c0_33] : memref<128x1xf32, #tpu.memory_space<vmem>>, vector<128x1xf32>
      %66 = arith.extui %57 : vector<128x128xi1> to vector<128x128xi32>
      %67 = arith.sitofp %66 : vector<128x128xi32> to vector<128x128xf32>
      %cst_34 = arith.constant dense<0.000000e+00> : vector<128xf32>
      %68 = vector.multi_reduction <add>, %67, %cst_34 [1] : vector<128x128xf32> to vector<128xf32>
      %69 = vector.shape_cast %68 : vector<128xf32> to vector<128x1xf32>
      %70 = arith.addf %65, %69 : vector<128x1xf32>
      %c0_35 = arith.constant 0 : index
      %c0_36 = arith.constant 0 : index
      %71 = vector.load %arg9[%c0_35, %c0_36] : memref<128x1xf32, #tpu.memory_space<vmem>>, vector<128x1xf32>
      tpu.vector_store %arg9[%c0_35, %c0_36], %70 {strides = array<i32>} : memref<128x1xf32, #tpu.memory_space<vmem>>, vector<128x1xf32>,
    } else {
    }
    %true = arith.constant true
    %34 = arith.xori %31, %true : i1
    %35 = arith.extui %34 : i1 to i32
    %c0_i32_16 = arith.constant 0 : i32
    %36 = arith.cmpi ne, %35, %c0_i32_16 : i32
    scf.if %36 {
      %c0_19 = arith.constant 0 : index
      %c0_20 = arith.constant 0 : index
      %40 = vector.load %arg10[%c0_19, %c0_20] : memref<128x1xf32, #tpu.memory_space<vmem>>, vector<128x1xf32>
      %cst_21 = arith.constant dense<0.000000e+00> : vector<128xf32>
      %41 = vector.multi_reduction <add>, %18, %cst_21 [1] : vector<128x128xf32> to vector<128xf32>
      %42 = vector.shape_cast %41 : vector<128xf32> to vector<128x1xf32>
      %43 = arith.addf %40, %42 : vector<128x1xf32>
      %c0_22 = arith.constant 0 : index
      %c0_23 = arith.constant 0 : index
      %44 = vector.load %arg10[%c0_22, %c0_23] : memref<128x1xf32, #tpu.memory_space<vmem>>, vector<128x1xf32>
      tpu.vector_store %arg10[%c0_22, %c0_23], %43 {strides = array<i32>} : memref<128x1xf32, #tpu.memory_space<vmem>>, vector<128x1xf32>,
      %c0_24 = arith.constant 0 : index
      %c0_25 = arith.constant 0 : index
      %45 = vector.load %arg8[%c0_24, %c0_25] : memref<128x1xf32, #tpu.memory_space<vmem>>, vector<128x1xf32>
      %cst_26 = arith.constant 0.000000e+00 : f32
      %46 = vector.broadcast %cst_26 : f32 to vector<128x128xf32>
      %47 = arith.select %23, %17, %46 : vector<128x128xi1>, vector<128x128xf32>
      %cst_27 = arith.constant dense<0.000000e+00> : vector<128xf32>
      %48 = vector.multi_reduction <add>, %47, %cst_27 [1] : vector<128x128xf32> to vector<128xf32>
      %49 = vector.shape_cast %48 : vector<128xf32> to vector<128x1xf32>
      %50 = arith.addf %45, %49 : vector<128x1xf32>
      %c0_28 = arith.constant 0 : index
      %c0_29 = arith.constant 0 : index
      %51 = vector.load %arg8[%c0_28, %c0_29] : memref<128x1xf32, #tpu.memory_space<vmem>>, vector<128x1xf32>
      tpu.vector_store %arg8[%c0_28, %c0_29], %50 {strides = array<i32>} : memref<128x1xf32, #tpu.memory_space<vmem>>, vector<128x1xf32>,
      %c0_30 = arith.constant 0 : index
      %c0_31 = arith.constant 0 : index
      %52 = vector.load %arg9[%c0_30, %c0_31] : memref<128x1xf32, #tpu.memory_space<vmem>>, vector<128x1xf32>
      %53 = arith.extui %23 : vector<128x128xi1> to vector<128x128xi32>
      %54 = arith.sitofp %53 : vector<128x128xi32> to vector<128x128xf32>
      %cst_32 = arith.constant dense<0.000000e+00> : vector<128xf32>
      %55 = vector.multi_reduction <add>, %54, %cst_32 [1] : vector<128x128xf32> to vector<128xf32>
      %56 = vector.shape_cast %55 : vector<128xf32> to vector<128x1xf32>
      %57 = arith.addf %52, %56 : vector<128x1xf32>
      %c0_33 = arith.constant 0 : index
      %c0_34 = arith.constant 0 : index
      %58 = vector.load %arg9[%c0_33, %c0_34] : memref<128x1xf32, #tpu.memory_space<vmem>>, vector<128x1xf32>
      tpu.vector_store %arg9[%c0_33, %c0_34], %57 {strides = array<i32>} : memref<128x1xf32, #tpu.memory_space<vmem>>, vector<128x1xf32>,
    } else {
    }
    %c0_i32_17 = arith.constant 0 : i32
    %37 = arith.cmpi eq, %arg1, %c0_i32_17 : i32
    %38 = arith.extui %37 : i1 to i32
    %c0_i32_18 = arith.constant 0 : i32
    %39 = arith.cmpi ne, %38, %c0_i32_18 : i32
    scf.if %39 {
      %c0_19 = arith.constant 0 : index
      %c0_20 = arith.constant 0 : index
      %40 = vector.load %arg9[%c0_19, %c0_20] : memref<128x1xf32, #tpu.memory_space<vmem>>, vector<128x1xf32>
      %cst_21 = arith.constant 9.99999997E-7 : f32
      %41 = vector.broadcast %cst_21 : f32 to vector<128x1xf32>
      %42 = arith.cmpf olt, %40, %41 : vector<128x1xf32>
      %cst_22 = arith.constant 1.000000e+00 : f32
      %43 = vector.broadcast %cst_22 : f32 to vector<128x1xf32>
      %44 = arith.select %42, %43, %40 : vector<128x1xi1>, vector<128x1xf32>
      %c0_23 = arith.constant 0 : index
      %c0_24 = arith.constant 0 : index
      %45 = vector.load %arg8[%c0_23, %c0_24] : memref<128x1xf32, #tpu.memory_space<vmem>>, vector<128x1xf32>
      %c0_25 = arith.constant 0 : index
      %c0_26 = arith.constant 0 : index
      %46 = vector.load %arg10[%c0_25, %c0_26] : memref<128x1xf32, #tpu.memory_space<vmem>>, vector<128x1xf32>
      %cst_27 = arith.constant 1.000000e-30 : f32
      %47 = vector.broadcast %cst_27 : f32 to vector<128x1xf32>
      %48 = arith.maximumf %46, %47 : vector<128x1xf32>
      %49 = math.log %48 : vector<128x1xf32>
      %50 = arith.mulf %40, %49 : vector<128x1xf32>
      %51 = arith.subf %45, %50 : vector<128x1xf32>
      %52 = arith.divf %51, %44 : vector<128x1xf32>
      %53 = tpu.iota {dimensions = array<i32: 0>} : vector<128x1xi32>
      %54 = vector.broadcast %0 : i32 to vector<128x1xi32>
      %55 = arith.addi %54, %53 : vector<128x1xi32>
      %c16_i32_28 = arith.constant 16 : i32
      %56 = vector.broadcast %c16_i32_28 : i32 to vector<128x1xi32>
      %57 = arith.cmpi slt, %55, %56 : vector<128x1xi32>
      %cst_29 = arith.constant 0.000000e+00 : f32
      %58 = vector.broadcast %cst_29 : f32 to vector<128x1xf32>
      %59 = arith.select %57, %52, %58 : vector<128x1xi1>, vector<128x1xf32>
      %60 = vector.shape_cast %59 : vector<128x1xf32> to vector<128x1xf32>
      %61 = vector.broadcast %60 : vector<128x1xf32> to vector<128x128xf32>
      %c0_30 = arith.constant 0 : index
      %c0_31 = arith.constant 0 : index
      %62 = vector.load %arg6[%c0_30, %c0_31] : memref<128x128xf32, #tpu.memory_space<vmem>>, vector<128x128xf32>
      tpu.vector_store %arg6[%c0_30, %c0_31], %61 {strides = array<i32>} : memref<128x128xf32, #tpu.memory_space<vmem>>, vector<128x128xf32>,
    } else {
    }
    return
  }
  func.func @transform_0(%arg0: i32, %arg1: i32) -> (i32, i32) {
    %c0_i32 = arith.constant 0 : i32
    %c0_i32_0 = arith.constant 0 : i32
    return %arg0, %c0_i32 : i32, i32
  }
  func.func @transform_1(%arg0: i32, %arg1: i32) -> (i32, i32) {
    %c0_i32 = arith.constant 0 : i32
    %c0_i32_0 = arith.constant 0 : i32
    return %c0_i32, %arg1 : i32, i32
  }
  func.func @transform_2(%arg0: i32, %arg1: i32) -> (i32, i32) {
    %c0_i32 = arith.constant 0 : i32
    %c0_i32_0 = arith.constant 0 : i32
    return %arg0, %c0_i32 : i32, i32
  }
  func.func @transform_3(%arg0: i32, %arg1: i32) -> (i32, i32) {
    %c0_i32 = arith.constant 0 : i32
    %c0_i32_0 = arith.constant 0 : i32
    return %c0_i32, %arg1 : i32, i32
  }
  func.func @transform_4(%arg0: i32, %arg1: i32) -> (i32, i32) {
    %c0_i32 = arith.constant 0 : i32
    %c0_i32_0 = arith.constant 0 : i32
    return %arg0, %c0_i32 : i32, i32
  }
}

</mosaic_0001>

<bundles_post_ra>
// kernel: tpu_custom_call.1
= control target key start
LH: loop header
LB: loop body
LE: loop exit
PB: predicated region body
PF: predicated region fallthrough
CT: control target
= control target key end

     0   :  { %vm2765_vm0 = vcmask 261120   ;;  %s2760_s0 = inlined_call_operand.vmem [shape: f32[128,32], index: 0, kind: input, shape index: {}]   ;;  %s2761_s1 = inlined_call_operand.vmem [shape: f32[32,128], index: 1, kind: input, shape index: {}]   ;;  %s2762_s2 = inlined_call_operand.vmem [shape: s32[128,1], index: 2, kind: input, shape index: {}]   ;;  %s2763_s3 = inlined_call_operand.vmem [shape: s32[1,128], index: 3, kind: input, shape index: {}]   ;;  %s2764_s4 = inlined_call_operand.hbm [shape: f32[128,128], index: 4, kind: output, shape index: {}]  }
   0x1   :  { %v1970_v0 = vld [vmem:[%s2760_s0 + $0x40] sm:$0xff]  ;;  %v1980_v2 = vld [vmem:[%s2760_s0 + $0x48] sm:$0xff]  ;;  %v1996_v7 = vld [vmem:[%s2760_s0 + $0x50] sm:$0xff] }
   0x2   :  { %v1975_v1 = vld [vmem:[%s2760_s0] sm:$0xff]  ;;  %v97_v3 = vmul.f32 %v1970_v0, %v1970_v0  ;;  %v98_v5 = vmul.f32 %v1980_v2, %v1980_v2  ;;  %v1991_v6 = vld [vmem:[%s2760_s0 + $0x8] sm:$0xff]  ;;  %v2001_v8 = vld [vmem:[%s2760_s0 + $0x10] sm:$0xff]  ;;  %v99_v12 = vmul.f32 %v1996_v7, %v1996_v7 }
   0x3   :  { %v89_v4 = vmul.f32 %v1975_v1, %v1975_v1  ;;  %v90_v9 = vmul.f32 %v1991_v6, %v1991_v6  ;;  %v91_v13 = vmul.f32 %v2001_v8, %v2001_v8  ;;  %v2016_v16 = vld [vmem:[%s2760_s0 + $0x58] sm:$0xff]  ;;  %v2026_v18 = vld [vmem:[%s2761_s1] sm:$0xff]  ;;  %v2031_v19 = vld [vmem:[%s2761_s1 + $0x8] sm:$0xff] }
   0x4   :  { %v130_v10 = vsel %vm2765_vm0, %v97_v3, 0.0  ;;  %v133_v14 = vsel %vm2765_vm0, %v98_v5, 0.0  ;;  %v2021_v17 = vld [vmem:[%s2760_s0 + $0x18] sm:$0xff]  ;;  %v2036_v20 = vld [vmem:[%s2761_s1 + $0x10] sm:$0xff] }
   0x5   :  { %v106_v11 = vsel %vm2765_vm0, %v89_v4, 0.0  ;;  %131 = vadd.xlane.f32.xlu1 %v130_v10  ;;  %v109_v15 = vsel %vm2765_vm0, %v90_v9, 0.0 }
   0x6   :  { %107 = vadd.xlane.f32.xlu0 %v106_v11 }
   0x7   :  { %9 = vsyncpa [#allocation7], 0  ;;  %v136_v21 = vsel %vm2765_vm0, %v99_v12, 0.0  ;;  %v112_v22 = vsel %vm2765_vm0, %v91_v13, 0.0  ;;  %v100_v23 = vmul.f32 %v2016_v16, %v2016_v16  ;;  %v237_v24 = vld [vmem:[%s2761_s1 + $0x18] sm:$0xff]  ;;  %v92_v25 = vmul.f32 %v2021_v17, %v2021_v17  ;;  %v2056_v29 = vld [vmem:[%s2760_s0 + $0x60] sm:$0xff] }
   0x8   :  { %v238_v26 = vmul.f32 %v2026_v18, %v2026_v18  ;;  %v239_v27 = vmul.f32 %v2031_v19, %v2031_v19  ;;  %v240_v28 = vmul.f32 %v2036_v20, %v2036_v20  ;;  %v2061_v30 = vld [vmem:[%s2760_s0 + $0x20] sm:$0xff]  ;;  %v241_v31 = vmul.f32 %v237_v24, %v237_v24  ;;  %v2072_v37 = vld [vmem:[%s2760_s0 + $0x68] sm:$0xff]  ;;  %v2088_v45 = vld [vmem:[%s2760_s0 + $0x70] sm:$0xff] }
   0x9   :  { %134 = vadd.xlane.f32.xlu1 %v133_v14  ;;  %v139_v33 = vsel %vm2765_vm0, %v100_v23, 0.0  ;;  %v115_v34 = vsel %vm2765_vm0, %v92_v25, 0.0  ;;  %v101_v35 = vmul.f32 %v2056_v29, %v2056_v29  ;;  %v93_v36 = vmul.f32 %v2061_v30, %v2061_v30  ;;  %v2077_v39 = vld [vmem:[%s2760_s0 + $0x28] sm:$0xff]  ;;  %v2093_v47 = vld [vmem:[%s2760_s0 + $0x30] sm:$0xff]  ;;  %v2104_v53 = vld [vmem:[%s2760_s0 + $0x78] sm:$0xff] }
   0xa   :  { %110 = vadd.xlane.f32.xlu0 %v109_v15  ;;  %v242_v32 = vadd.f32 %v239_v27, %v238_v26  ;;  %v102_v41 = vmul.f32 %v2072_v37, %v2072_v37  ;;  %v94_v44 = vmul.f32 %v2077_v39, %v2077_v39  ;;  %v103_v49 = vmul.f32 %v2088_v45, %v2088_v45  ;;  %v2109_v55 = vld [vmem:[%s2760_s0 + $0x38] sm:$0xff]  ;;  %v520_v23 = vld [vmem:[%s2762_s2 + $0x28] sm:$0xff]  ;;  %v523_v27 = vld [vmem:[%s2762_s2 + $0x40] sm:$0xff] }
   0xb   :  { %v142_v42 = vsel %vm2765_vm0, %v101_v35, 0.0  ;;  %v118_v43 = vsel %vm2765_vm0, %v93_v36, 0.0  ;;  %v95_v52 = vmul.f32 %v2093_v47, %v2093_v47  ;;  %v104_v57 = vmul.f32 %v2104_v53, %v2104_v53  ;;  %v522_v25 = vld [vmem:[%s2762_s2 + $0x38] sm:$0xff]  ;;  %v524_v26 = vld [vmem:[%s2762_s2 + $0x48] sm:$0xff]  ;;  %v529_v35 = vld [vmem:[%s2762_s2 + $0x70] sm:$0xff] }
   0xc   :  { %v243_v38 = vadd.f32 %v242_v32, %v240_v28  ;;  %v145_v50 = vsel %vm2765_vm0, %v102_v41, 0.0  ;;  %v121_v51 = vsel %vm2765_vm0, %v94_v44, 0.0  ;;  %v148_v58 = vsel %vm2765_vm0, %v103_v49, 0.0  ;;  %v526_v28 = vld [vmem:[%s2762_s2 + $0x58] sm:$0xff]  ;;  %v528_v32 = vld [vmem:[%s2762_s2 + $0x68] sm:$0xff] }
   0xd   :  { %137 = vadd.xlane.f32.xlu1 %v136_v21  ;;  %v124_v59 = vsel %vm2765_vm0, %v95_v52, 0.0  ;;  %v96_v60 = vmul.f32 %v2109_v55, %v2109_v55  ;;  %v151_v63 = vsel %vm2765_vm0, %v104_v57, 0.0  ;;  %v1937_v5 = vmov 0   ;;  %v516_v21 = vld [vmem:[%s2762_s2 + $0x8] sm:$0xff] }
   0xe   :  { %113 = vadd.xlane.f32.xlu0 %v112_v22  ;;  %v244_v40 = vadd.f32 %v243_v38, %v241_v31  ;;  %1803 = vset.pattern.permute.xlu1 %v1937_v5  ;;  %v515_v22 = vld [vmem:[%s2762_s2] sm:$0xff]  ;;  %v525_v31 = vld [vmem:[%s2762_s2 + $0x50] sm:$0xff]  ;;  %v1938_v36 = vmov 0.0  }
   0xf   :  { %v127_v3 = vsel %vm2765_vm0, %v96_v60, 0.0  ;;  %1802 = vset.pattern.permute.xlu0 %v1937_v5 }
  0x10   :  { %v245_v46 = vrot.slane %v244_v40, 4 }
  0x11   :  { %140 = vadd.xlane.f32.xlu1 %v139_v33  ;;  %v527_v33 = vld [vmem:[%s2762_s2 + $0x60] sm:$0xff] }
  0x12   :  { %116 = vadd.xlane.f32.xlu0 %v115_v34  ;;  %v246_v48 = vadd.f32 %v245_v46, %v244_v40  ;;  %v530_v34 = vld [vmem:[%s2762_s2 + $0x78] sm:$0xff] }
  0x14   :  { %v247_v54 = vrot.slane %v246_v48, 2 }
  0x15   :  { %143 = vadd.xlane.f32.xlu1 %v142_v42 }
  0x16   :  { %119 = vadd.xlane.f32.xlu0 %v118_v43  ;;  %v248_v56 = vadd.f32 %v247_v54, %v246_v48 }
  0x18   :  { %v249_v61 = vrot.slane %v248_v56, 1 }
  0x19   :  { %146 = vadd.xlane.f32.xlu1 %v145_v50 }
  0x1a   :  { %122 = vadd.xlane.f32.xlu0 %v121_v51  ;;  %v250_v62 = vadd.f32 %v249_v61, %v248_v56 }
  0x1c   :  { %v251_v4 = vmax.f32 %v250_v62, 1e-24 }
  0x1d   :  { %149 = vadd.xlane.f32.xlu1 %v148_v58 }
  0x1e   :  { %125 = vadd.xlane.f32.xlu0 %v124_v59  ;;  %1839 = vrsqrt.f32 %v251_v4 }
  0x21   :  { %152 = vadd.xlane.f32.xlu1 %v151_v63 }
  0x22   :  { %128 = vadd.xlane.f32.xlu0 %v127_v3 }
  0x28   :  { %v1840_v9 = vpop.eup %1839 }
  0x29   :  { %v253_v10 = vmul.f32 %v1840_v9, %v2026_v18  ;;  %v254_v11 = vmul.f32 %v1840_v9, %v2031_v19  ;;  %v255_v12 = vmul.f32 %v1840_v9, %v2036_v20  ;;  %v256_v13 = vmul.f32 %v1840_v9, %v237_v24  ;;  %v517_v18 = vld [vmem:[%s2762_s2 + $0x10] sm:$0xff]  ;;  %v518_v19 = vld [vmem:[%s2762_s2 + $0x18] sm:$0xff]  ;;  %v519_v20 = vld [vmem:[%s2762_s2 + $0x20] sm:$0xff] }
  0x2a   :  { %v521_v24 = vld [vmem:[%s2762_s2 + $0x30] sm:$0xff] }
  0x2b   :  { %v1785_v14 = vpack.c.bf16 %v254_v11, %v253_v10  ;;  %v1789_v15 = vpack.c.bf16 %v256_v13, %v255_v12 }
  0x2d   :  { %1786 = vmatprep.subr.bf16.mxu0 %v1785_v14  ;;  %1793 = vmatprep.subr.bf16.mxu1 %v1785_v14 }
  0x2e   :  { %1788 = vmatpush3.bf16.msra.mxu0 %v1785_v14  ;;  %1795 = vmatpush3.bf16.msra.mxu1 %v1785_v14  ;;  %v611_v14 = vlaneseq }
  0x2f   :  { %1790 = vmatprep.subr.bf16.mxu0 %v1789_v15  ;;  %1794 = vmatprep.subr.bf16.mxu1 %v1789_v15 }
  0x32   :  { %536 = vperm.xlu1 %1803, %v516_v21   ;;  %1792 = vmatpush3.bf16.msra.mxu0 %v1789_v15 }
  0x33   :  { %1796 = vmatpush3.bf16.msra.mxu1 %v1789_v15 }
  0x36   :  { %539 = vperm.xlu1 %1803, %v517_v18  }
  0x38   :  { %533 = vperm.xlu0 %1802, %v515_v22  }
  0x3a   :  { %542 = vperm.xlu1 %1803, %v518_v19  }
  0x3c   :  { %560 = vperm.xlu0 %1802, %v524_v26  }
  0x3e   :  { %545 = vperm.xlu1 %1803, %v519_v20  }
  0x40   :  { %566 = vperm.xlu0 %1802, %v526_v28  }
  0x42   :  { %548 = vperm.xlu1 %1803, %v520_v23  }
  0x44   :  { %572 = vperm.xlu0 %1802, %v528_v32  }
  0x46   :  { %551 = vperm.xlu1 %1803, %v521_v24  }
  0x48   :  { %578 = vperm.xlu0 %1802, %v530_v34  }
  0x4a   :  { %554 = vperm.xlu1 %1803, %v522_v25   ;;  %v2180_v25 = vshrl.u32 %v611_v14, 7 }
  0x4c   :  { %1810 = vperm.xlu0 %1802, %v1938_v36  }
  0x4e   :  { %557 = vperm.xlu1 %1803, %v523_v27  }
  0x52   :  { %563 = vperm.xlu1 %1803, %v525_v31   ;;  %v613_v31 = vadd.s32 8, %v2180_v25 }
  0x56   :  { %569 = vperm.xlu1 %1803, %v527_v33  }
  0x5a   :  { %575 = vperm.xlu1 %1803, %v529_v35  }
  0x5e   :  { %1805 = vperm.xlu1 %1803, %v1938_v36  }
  0x62   :  { %1815 = vperm.xlu1 %1803, %v1938_v36  }
  0x92   :  { %v132_v38 = vpop.xlane.xlu1 %131 }
  0x93   :  { %v108_v40 = vpop.xlane.xlu0 %107  ;;  %v162_v41 = vmax.f32 %v132_v38, 1e-24 }
  0x94   :  { %v154_v42 = vmax.f32 %v108_v40, 1e-24 }
  0x95   :  { %1841 = vrsqrt.f32 %v162_v41 }
  0x96   :  { %1843 = vrsqrt.f32 %v154_v42  ;;  %v135_v43 = vpop.xlane.xlu1 %134  ;;  %v2188_v42 = vand.u32 127, %v611_v14 }
  0x97   :  { %v111_v44 = vpop.xlane.xlu0 %110  ;;  %v163_v46 = vmax.f32 %v135_v43, 1e-24 }
  0x98   :  { %v155_v48 = vmax.f32 %v111_v44, 1e-24  ;;  %vm650_vm1 = vcmp.ne.s32.totalorder %v613_v31, %v2188_v42  ;;  %vm2766_vm2 = vcmp.lt.s32.totalorder %v2188_v42, 16  ;;  %vm649_vm8 = vcmp.ne.s32.totalorder %v2180_v25, %v2188_v42 }
  0x99   :  { %1845 = vrsqrt.f32 %v163_v46  ;;  %vm2204_vm3 = vmand %vm650_vm1, %vm2766_vm2 }
  0x9a   :  { %1847 = vrsqrt.f32 %v155_v48  ;;  %v138_v49 = vpop.xlane.xlu1 %137  ;;  %vm2268_vm13 = vmand %vm649_vm8, %vm2766_vm2 }
  0x9b   :  { %v114_v50 = vpop.xlane.xlu0 %113  ;;  %v164_v51 = vmax.f32 %v138_v49, 1e-24 }
  0x9c   :  { %v156_v52 = vmax.f32 %v114_v50, 1e-24 }
  0x9d   :  { %1849 = vrsqrt.f32 %v164_v51 }
  0x9e   :  { %1851 = vrsqrt.f32 %v156_v52  ;;  %v141_v54 = vpop.xlane.xlu1 %140 }
  0x9f   :  { %v117_v56 = vpop.xlane.xlu0 %116  ;;  %v1842_v57 = vpop.eup %1841  ;;  %v165_v58 = vmax.f32 %v141_v54, 1e-24 }
  0xa0   :  { %v157_v59 = vmax.f32 %v117_v56, 1e-24  ;;  %v1844_v60 = vpop.eup %1843  ;;  %v194_v61 = vmul.f32 10.0, %v1842_v57 }
  0xa1   :  { %v186_v62 = vmul.f32 10.0, %v1844_v60  ;;  %1853 = vrsqrt.f32 %v165_v58  ;;  %v2212_v58 = vld [vmem:[%s2763_s3] ss:$0 sm:$0xff]  ;;  %v615_v60 = vadd.s32 24, %v2180_v25  ;;  %s1939_s3 = smov [#allocation6]  }
  0xa2   :  { %v210_v63 = vmul.f32 %v194_v61, %v1970_v0  ;;  %1855 = vrsqrt.f32 %v157_v59  ;;  %v144_v3 = vpop.xlane.xlu1 %143  ;;  %s1657_s6 = sshll.u32 %s1939_s3, 4  ;;  %s1658_s6 = int_to_ptr.vmem [resolvable:$true] %s1657_s6 }
  0xa3   :  { %v120_v4 = vpop.xlane.xlu0 %119  ;;  %v1846_v5 = vpop.eup %1845  ;;  %v202_v9 = vmul.f32 %v186_v62, %v1975_v1  ;;  %v166_v10 = vmax.f32 %v144_v3, 1e-24  ;;  %v614_v3 = vadd.s32 16, %v2180_v25  ;;  %vm652_vm6 = vcmp.ne.s32.totalorder %v615_v60, %v2188_v42  ;;  %s1913_s7 = scalar_lea.vmem %s1658_s6, 2048  ;;  %p1918_p1 = scmp.lt.s32.totalorder %s1658_s6, %s1658_s6 }
  0xa4   :  { %v158_v11 = vmax.f32 %v120_v4, 1e-24  ;;  %v1848_v12 = vpop.eup %1847  ;;  %226 = vst.msk [vmem:[#allocation2 + $0x40] sm:$0xff] %vm2765_vm0, %v210_v63  ;;  %v195_v13 = vmul.f32 10.0, %v1846_v5  ;;  %vm2246_vm9 = vmand %vm652_vm6, %vm2766_vm2  ;;  %p1914_p0 = scmp.ne.s32.totalorder %s1658_s6, %s1913_s7  ;;  %p1919_p2 = scmp.lt.s32.totalorder %s1913_s7, %s1913_s7 }
  0xa5   :  { %218 = vst.msk [vmem:[#allocation2] sm:$0xff] %vm2765_vm0, %v202_v9  ;;  %v187_v15 = vmul.f32 10.0, %v1848_v12  ;;  %1857 = vrsqrt.f32 %v166_v10  ;;  %vm651_vm7 = vcmp.ne.s32.totalorder %v614_v3, %v2188_v42  ;;  %v2816_v3 = vmov 0 }
  0xa6   :  { %v211_v21 = vmul.f32 %v195_v13, %v1980_v2  ;;  %1859 = vrsqrt.f32 %v158_v11  ;;  %v147_v0 = vpop.xlane.xlu1 %146  ;;  %vm2256_vm11 = vmand %vm651_vm7, %vm2766_vm2  ;;  %p1920_p3 = por %p1919_p2, %p1918_p1 }
  0xa7   :  { %v123_v18 = vpop.xlane.xlu0 %122  ;;  %v1850_v19 = vpop.eup %1849  ;;  %v203_v20 = vmul.f32 %v187_v15, %v1991_v6  ;;  %v167_v1 = vmax.f32 %v147_v0, 1e-24 }
  0xa8   :  { %v159_v22 = vmax.f32 %v123_v18, 1e-24  ;;  %v1852_v23 = vpop.eup %1851  ;;  %227 = vst.msk [vmem:[#allocation2 + $0x48] sm:$0xff] %vm2765_vm0, %v211_v21  ;;  %v196_v24 = vmul.f32 10.0, %v1850_v19  ;;  %p1921_p4 = pnand %p1920_p3, %p1914_p0 }
  0xa9   :  { %219 = vst.msk [vmem:[#allocation2 + $0x8] sm:$0xff] %vm2765_vm0, %v203_v20  ;;  %v188_v26 = vmul.f32 10.0, %v1852_v23  ;;  %1861 = vrsqrt.f32 %v167_v1  ;;  %v617_v23 = vadd.s32 40, %v2180_v25 }
  0xaa   :  { %v212_v2 = vmul.f32 %v196_v24, %v1996_v7  ;;  %1863 = vrsqrt.f32 %v159_v22  ;;  %v150_v27 = vpop.xlane.xlu1 %149  ;;  %v2792_v22 = vmov 0 }
  0xab   :  { %v126_v28 = vpop.xlane.xlu0 %125  ;;  %v1854_v6 = vpop.eup %1853  ;;  %v204_v32 = vmul.f32 %v188_v26, %v2001_v8  ;;  %v168_v33 = vmax.f32 %v150_v27, 1e-24  ;;  %v265_v35 = vld [vmem:[#allocation2 + $0x40] sm:$0xff]  ;;  %v2793_v22 = vsel %vm2256_vm11, 4294967295, %v2792_v22  ;;  %vm654_vm7 = vcmp.ne.s32.totalorder %v617_v23, %v2188_v42 }
  0xac   :  { %v160_v34 = vmax.f32 %v126_v28, 1e-24  ;;  %v1856_v38 = vpop.eup %1855  ;;  %228 = vst.msk [vmem:[#allocation2 + $0x50] sm:$0xff] %vm2765_vm0, %v212_v2  ;;  %v197_v40 = vmul.f32 10.0, %v1854_v6  ;;  %v257_v41 = vld [vmem:[#allocation2] sm:$0xff]  ;;  %1773 = vmatprep.mubr.msk.f32.mxu1 %vm2765_vm0, %v265_v35  ;;  %v2836_v23 = vmov 0 }
  0xad   :  { %220 = vst.msk [vmem:[#allocation2 + $0x10] sm:$0xff] %vm2765_vm0, %v204_v32  ;;  %v189_v7 = vmul.f32 10.0, %v1856_v38  ;;  %1865 = vrsqrt.f32 %v168_v33  ;;  %1761 = vmatprep.mubr.msk.f32.mxu0 %vm2765_vm0, %v257_v41  ;;  %v2798_v33 = vmov 0  ;;  %v618_v41 = vadd.s32 48, %v2180_v25 }
  0xae   :  { %v213_v8 = vmul.f32 %v197_v40, %v2016_v16  ;;  %1867 = vrsqrt.f32 %v160_v34  ;;  %v153_v43 = vpop.xlane.xlu1 %152 }
  0xaf   :  { %v129_v44 = vpop.xlane.xlu0 %128  ;;  %v1858_v46 = vpop.eup %1857  ;;  %v205_v48 = vmul.f32 %v189_v7, %v2021_v17  ;;  %v169_v49 = vmax.f32 %v153_v43, 1e-24  ;;  %v266_v51 = vld [vmem:[#allocation2 + $0x48] sm:$0xff]  ;;  %v2786_v17 = vmov 0  ;;  %v2802_v43 = vmov 0 }
  0xb0   :  { %v161_v50 = vmax.f32 %v129_v44, 1e-24  ;;  %v1860_v52 = vpop.eup %1859  ;;  %229 = vst.msk [vmem:[#allocation2 + $0x58] sm:$0xff] %vm2765_vm0, %v213_v8  ;;  %v198_v54 = vmul.f32 10.0, %v1858_v46  ;;  %v258_v56 = vld [vmem:[#allocation2 + $0x8] sm:$0xff]  ;;  %1774 = vmatmul.mubr.msk.f32.vlgmr.msra.gmra.mrb[0].mxu1 %vm2765_vm0, %v266_v51  ;;  %v2787_v17 = vsel %vm2204_vm3, 4294967295, %v2786_v17 }
  0xb1   :  { %221 = vst.msk [vmem:[#allocation2 + $0x18] sm:$0xff] %vm2765_vm0, %v205_v48  ;;  %v190_v16 = vmul.f32 10.0, %v1860_v52  ;;  %1869 = vrsqrt.f32 %v169_v49  ;;  %1762 = vmatmul.mubr.msk.f32.vlgmr.msra.gmra.mrb[0].mxu0 %vm2765_vm0, %v258_v56  ;;  %v2804_v48 = vmov 0  ;;  %v619_v51 = vadd.s32 56, %v2180_v25 }
  0xb2   :  { %v214_v57 = vmul.f32 %v198_v54, %v2056_v29  ;;  %1871 = vrsqrt.f32 %v161_v50  ;;  %v537_v59 = vpop.permute.xlu1 %536  ;;  %v2806_v50 = vmov 0  ;;  %v623_v54 = vadd.s32 88, %v2180_v25 }
  0xb3   :  { %v1862_v61 = vpop.eup %1861  ;;  %v206_v62 = vmul.f32 %v190_v16, %v2061_v30  ;;  %v267_v63 = vld [vmem:[#allocation2 + $0x50] sm:$0xff]  ;;  %vm585_vm4 = vcmp.eq.s32.totalorder %v537_v59, %v2212_v58  ;;  %v2809_v16 = vmov 0  ;;  %v2813_v59 = vmov 0 }
  0xb4   :  { %v1864_v4 = vpop.eup %1863  ;;  %230 = vst.msk [vmem:[#allocation2 + $0x60] sm:$0xff] %vm2765_vm0, %v214_v57  ;;  %v199_v29 = vmul.f32 10.0, %v1862_v61  ;;  %v259_v5 = vld [vmem:[#allocation2 + $0x10] sm:$0xff]  ;;  %1776 = vmatprep.mubr.msk.f32.mxu1 %vm2765_vm0, %v267_v63  ;;  %vm2222_vm5 = vmand %vm585_vm4, %vm2204_vm3 }
  0xb5   :  { %222 = vst.msk [vmem:[#allocation2 + $0x20] sm:$0xff] %vm2765_vm0, %v206_v62  ;;  %v191_v30 = vmul.f32 10.0, %v1864_v4  ;;  %1764 = vmatprep.mubr.msk.f32.mxu0 %vm2765_vm0, %v259_v5  ;;  %v1702_v10 = vsel %vm2222_vm5, 1.0, %v1938_v36  ;;  %v620_v62 = vadd.s32 64, %v2180_v25  ;;  %v625_v4 = vadd.s32 104, %v2180_v25 }
  0xb6   :  { %v215_v11 = vmul.f32 %v199_v29, %v2072_v37  ;;  %v540_v12 = vpop.permute.xlu1 %539  ;;  %941 = vadd.xlane.f32.xlu1 %v1702_v10  ;;  %v616_v37 = vadd.s32 32, %v2180_v25  ;;  %v2819_v5 = vmov 0  ;;  %v2823_v10 = vmov 0 }
  0xb7   :  { %v1866_v13 = vpop.eup %1865  ;;  %v207_v14 = vmul.f32 %v191_v30, %v2077_v39  ;;  %v268_v15 = vld [vmem:[#allocation2 + $0x58] sm:$0xff]  ;;  %v2790_v39 = vmov 0  ;;  %vm586_vm10 = vcmp.eq.s32.totalorder %v540_v12, %v2212_v58 }
  0xb8   :  { %v1868_v21 = vpop.eup %1867  ;;  %231 = vst.msk [vmem:[#allocation2 + $0x68] sm:$0xff] %vm2765_vm0, %v215_v11  ;;  %v200_v0 = vmul.f32 10.0, %v1866_v13  ;;  %v260_v18 = vld [vmem:[#allocation2 + $0x18] sm:$0xff]  ;;  %1777 = vmatmul.mubr.msk.f32.gmra.mrb[2].mxu1 %vm2765_vm0, %v268_v15  ;;  %v2791_v39 = vsel %vm2246_vm9, 4294967295, %v2790_v39  ;;  %vm653_vm14 = vcmp.ne.s32.totalorder %v616_v37, %v2188_v42  ;;  %vm2288_vm4 = vmand %vm586_vm10, %vm2256_vm11  ;;  %vm2812_vm11 = vcmp.lt.s32.totalorder %v2188_v42, 16 }
  0xb9   :  { %223 = vst.msk [vmem:[#allocation2 + $0x28] sm:$0xff] %vm2765_vm0, %v207_v14  ;;  %v192_v19 = vmul.f32 10.0, %v1868_v21  ;;  %1765 = vmatmul.mubr.msk.f32.gmra.mrb[2].mxu0 %vm2765_vm0, %v260_v18  ;;  %v2799_v33 = vsel %vm2288_vm4, 4294967295, %v2798_v33  ;;  %vm2313_vm10 = vmand %vm653_vm14, %vm2766_vm2  ;;  %v1703_v46 = vsel %vm2288_vm4, 1.0, %v1938_v36  ;;  %v622_v13 = vadd.s32 80, %v2180_v25 }
  0xba   :  { %v216_v20 = vmul.f32 %v200_v0, %v2088_v45  ;;  %v543_v1 = vpop.permute.xlu1 %542  ;;  %v2794_v45 = vmov 0  ;;  %v2803_v43 = vsel %vm2313_vm10, 4294967295, %v2802_v43  ;;  %v2826_v14 = vmov 0 }
  0xbb   :  { %v1870_v24 = vpop.eup %1869  ;;  %v208_v26 = vmul.f32 %v192_v19, %v2093_v47  ;;  %v269_v2 = vld [vmem:[#allocation2 + $0x60] sm:$0xff]  ;;  %vm587_vm12 = vcmp.eq.s32.totalorder %v543_v1, %v2212_v58  ;;  %v2795_v45 = vsel %vm2268_vm13, 4294967295, %v2794_v45  ;;  %v534_v47 = vpop.permute.xlu0 %533  ;;  %v627_v21 = vadd.s32 120, %v2180_v25 }
  0xbc   :  { %v1872_v27 = vpop.eup %1871  ;;  %232 = vst.msk [vmem:[#allocation2 + $0x70] sm:$0xff] %vm2765_vm0, %v216_v20  ;;  %v201_v28 = vmul.f32 10.0, %v1870_v24  ;;  %v261_v31 = vld [vmem:[#allocation2 + $0x20] sm:$0xff]  ;;  %1779 = vmatprep.mubr.msk.f32.mxu1 %vm2765_vm0, %v269_v2  ;;  %vm2277_vm15 = vmand %vm587_vm12, %vm2246_vm9  ;;  %vm584_vm1 = vcmp.eq.s32.totalorder %v534_v47, %v2212_v58  ;;  %v2830_v0 = vmov 0  ;;  %v2833_v18 = vmov 0 }
  0xbd   :  { %224 = vst.msk [vmem:[#allocation2 + $0x30] sm:$0xff] %vm2765_vm0, %v208_v26  ;;  %v193_v32 = vmul.f32 10.0, %v1872_v27  ;;  %1767 = vmatprep.mubr.msk.f32.mxu0 %vm2765_vm0, %v261_v31  ;;  %v1704_v34 = vsel %vm2277_vm15, 1.0, %v1938_v36  ;;  %vm2298_vm6 = vmand %vm584_vm1, %vm2268_vm13  ;;  %vm655_vm1 = vcmp.ne.s32.totalorder %v618_v41, %v2188_v42  ;;  %v624_v1 = vadd.s32 96, %v2180_v25 }
  0xbe   :  { %v217_v35 = vmul.f32 %v201_v28, %v2104_v53  ;;  %v546_v38 = vpop.permute.xlu1 %545  ;;  %945 = vadd.xlane.f32.xlu1 %v1704_v34  ;;  %v1701_v53 = vsel %vm2298_vm6, 1.0, %v1938_v36  ;;  %vm2327_vm12 = vmand %vm654_vm7, %vm2766_vm2  ;;  %vm2808_vm7 = vcmask 261120   ;;  %v2843_v28 = vmov 0 }
  0xbf   :  { %v209_v7 = vmul.f32 %v193_v32, %v2109_v55  ;;  %v270_v8 = vld [vmem:[#allocation2 + $0x68] sm:$0xff]  ;;  %vm588_vm8 = vcmp.eq.s32.totalorder %v546_v38, %v2212_v58  ;;  %939 = vadd.xlane.f32.xlu0 %v1701_v53  ;;  %v621_v55 = vadd.s32 72, %v2180_v25  ;;  %v2805_v48 = vsel %vm2327_vm12, 4294967295, %v2804_v48  ;;  %vm2355_vm9 = vmand %vm655_vm1, %vm2812_vm11  ;;  %v561_v11 = vpop.permute.xlu0 %560 }
  0xc0   :  { %233 = vst.msk [vmem:[#allocation2 + $0x78] sm:$0xff] %vm2765_vm0, %v217_v35  ;;  %v262_v44 = vld [vmem:[#allocation2 + $0x28] sm:$0xff]  ;;  %1780 = vmatmul.mubr.msk.f32.gmra.mrb[4].mxu1 %vm2765_vm0, %v270_v8  ;;  %vm2333_vm14 = vmand %vm588_vm8, %vm2313_vm10  ;;  %v2814_v59 = vsel %vm2355_vm9, 4294967295, %v2813_v59  ;;  %vm2818_vm1 = vcmask 261120   ;;  %v626_v32 = vadd.s32 112, %v2180_v25  ;;  %v2850_v25 = vmov 0 }
  0xc1   :  { %225 = vst.msk [vmem:[#allocation2 + $0x38] sm:$0xff] %vm2765_vm0, %v209_v7  ;;  %1768 = vmatmul.mubr.msk.f32.gmra.mrb[4].mxu0 %vm2765_vm0, %v262_v44  ;;  %v2807_v50 = vsel %vm2333_vm14, 4294967295, %v2806_v50  ;;  %vm658_vm8 = vcmp.ne.s32.totalorder %v621_v55, %v2188_v42  ;;  %vm2811_vm10 = vmmov %vm2808_vm7  ;;  %v1705_v57 = vsel %vm2333_vm14, 1.0, %v1938_v36 }
  0xc2   :  { %v549_v49 = vpop.permute.xlu1 %548  ;;  %vm2821_vm3 = vmmov %vm2818_vm1 }
  0xc3   :  { %v271_v52 = vld [vmem:[#allocation2 + $0x70] sm:$0xff]  ;;  %vm589_vm0 = vcmp.eq.s32.totalorder %v549_v49, %v2212_v58  ;;  %943 = vadd.xlane.f32.xlu0 %v1703_v46  ;;  %v567_v19 = vpop.permute.xlu0 %566 }
  0xc4   :  { %v263_v56 = vld [vmem:[#allocation2 + $0x30] sm:$0xff]  ;;  %1782 = vmatprep.mubr.msk.f32.mxu1 %vm2808_vm7, %v271_v52  ;;  %vm2344_vm2 = vmand %vm589_vm0, %vm2327_vm12  ;;  %vm656_vm0 = vcmp.ne.s32.totalorder %v619_v51, %v2188_v42 }
  0xc5   :  { %v2810_v16 = vsel %vm2344_vm2, 4294967295, %v2809_v16  ;;  %1770 = vmatprep.mubr.msk.f32.mxu0 %vm2811_vm10, %v263_v56  ;;  %v1706_v60 = vsel %vm2344_vm2, 1.0, %v1938_v36  ;;  %vm2815_vm7 = vmmov %vm2812_vm11  ;;  %vm660_vm11 = vcmp.ne.s32.totalorder %v623_v54, %v2188_v42 }
  0xc6   :  { %v552_v61 = vpop.permute.xlu1 %551  ;;  %949 = vadd.xlane.f32.xlu1 %v1706_v60  ;;  %vm2367_vm12 = vmand %vm658_vm8, %vm2815_vm7 }
  0xc7   :  { %v272_v63 = vld [vmem:[#allocation2 + $0x78] sm:$0xff]  ;;  %vm590_vm10 = vcmp.eq.s32.totalorder %v552_v61, %v2212_v58  ;;  %v2817_v3 = vsel %vm2367_vm12, 4294967295, %v2816_v3  ;;  %947 = vadd.xlane.f32.xlu0 %v1705_v57  ;;  %vm2822_vm8 = vmmov %vm2815_vm7  ;;  %v573_v31 = vpop.permute.xlu0 %572 }
  0xc8   :  { %v264_v29 = vld [vmem:[#allocation2 + $0x38] sm:$0xff]  ;;  %1783 = vmatmul.mubr.msk.f32.gmra.mrb[6].mxu1 %vm2818_vm1, %v272_v63  ;;  %vm2376_vm13 = vmand %vm590_vm10, %vm2355_vm9  ;;  %vm657_vm1 = vcmp.ne.s32.totalorder %v620_v62, %v2188_v42  ;;  %vm593_vm10 = vcmp.eq.s32.totalorder %v561_v11, %v2212_v58 }
  0xc9   :  { %v2820_v5 = vsel %vm2376_vm13, 4294967295, %v2819_v5  ;;  %1771 = vmatmul.mubr.msk.f32.gmra.mrb[6].mxu0 %vm2821_vm3, %v264_v29  ;;  %v1707_v30 = vsel %vm2376_vm13, 1.0, %v1938_v36  ;;  %vm2386_vm7 = vmand %vm656_vm0, %vm2822_vm8 }
  0xca   :  { %v2824_v10 = vsel %vm2386_vm7, 4294967295, %v2823_v10  ;;  %v555_v12 = vpop.permute.xlu1 %554  ;;  %vm2825_vm3 = vmmov %vm2822_vm8  ;;  %vm662_vm8 = vcmp.ne.s32.totalorder %v625_v4, %v2188_v42 }
  0xcb   :  { %vm2395_vm9 = vmand %vm660_vm11, %vm2825_vm3  ;;  %vm591_vm13 = vcmp.eq.s32.totalorder %v555_v12, %v2212_v58  ;;  %951 = vadd.xlane.f32.xlu0 %v1707_v30  ;;  %v579_v8 = vpop.permute.xlu0 %578 }
  0xcc   :  { %v2827_v14 = vsel %vm2395_vm9, 4294967295, %v2826_v14  ;;  %vm2402_vm0 = vmand %vm593_vm10, %vm2367_vm12  ;;  %vm659_vm10 = vcmp.ne.s32.totalorder %v622_v13, %v2188_v42 }
  0xcd   :  { %vm2410_vm14 = vmand %vm591_vm13, %vm2386_vm7  ;;  %vm595_vm13 = vcmp.eq.s32.totalorder %v567_v19, %v2212_v58  ;;  %v1710_v24 = vsel %vm2402_vm0, 1.0, %v1938_v36 }
  0xce   :  { %v2831_v0 = vsel %vm2410_vm14, 4294967295, %v2830_v0  ;;  %vm2832_vm11 = vmmov %vm2825_vm3  ;;  %v1708_v37 = vsel %vm2410_vm14, 1.0, %v1938_v36  ;;  %v558_v20 = vpop.permute.xlu1 %557  ;;  %vm664_vm14 = vcmp.ne.s32.totalorder %v627_v21, %v2188_v42 }
  0xcf   :  { %vm2416_vm3 = vmand %vm657_vm1, %vm2832_vm11  ;;  %953 = vadd.xlane.f32.xlu1 %v1708_v37  ;;  %vm592_vm1 = vcmp.eq.s32.totalorder %v558_v20, %v2212_v58  ;;  %v1811_v52 = vpop.permute.xlu0 %1810 }
  0xd0   :  { %v2834_v18 = vsel %vm2416_vm3, 4294967295, %v2833_v18  ;;  %vm2835_vm7 = vmmov %vm2832_vm11  ;;  %v1813_v56 = vunpack.i.h.bf16 %v1811_v52  ;;  %v1812_v57 = vunpack.i.l.bf16 %v1811_v52 }
  0xd1   :  { %vm2428_vm12 = vmand %vm662_vm8, %vm2835_vm7  ;;  %vm2842_vm8 = vcmp.lt.s32.totalorder %v2188_v42, 16 }
  0xd2   :  { %v2837_v23 = vsel %vm2428_vm12, 4294967295, %v2836_v23  ;;  %vm2438_vm11 = vmand %vm595_vm13, %vm2395_vm9  ;;  %v564_v47 = vpop.permute.xlu1 %563  ;;  %vm661_vm13 = vcmp.ne.s32.totalorder %v624_v1, %v2188_v42  ;;  %1641 = vst [vmem:[#allocation6 + $0x28] sm:$0xff] %v1813_v56 }
  0xd3   :  { %vm2445_vm7 = vmand %vm592_vm1, %vm2416_vm3  ;;  %vm597_vm1 = vcmp.eq.s32.totalorder %v573_v31, %v2212_v58  ;;  %957 = vadd.xlane.f32.xlu1 %v1710_v24  ;;  %v1712_v35 = vsel %vm2438_vm11, 1.0, %v1938_v36  ;;  %1640 = vst [vmem:[#allocation6 + $0x20] sm:$0xff] %v1812_v57 }
  0xd4   :  { %v1709_v27 = vsel %vm2445_vm7, 1.0, %v1938_v36  ;;  %vm2454_vm2 = vmand %vm659_vm10, %vm2842_vm8  ;;  %vm594_vm10 = vcmp.eq.s32.totalorder %v564_v47, %v2212_v58 }
  0xd5   :  { %v2844_v28 = vsel %vm2454_vm2, 4294967295, %v2843_v28  ;;  %955 = vadd.xlane.f32.xlu0 %v1709_v27  ;;  %vm2845_vm9 = vmmov %vm2842_vm8 }
  0xd6   :  { %vm2463_vm3 = vmand %vm664_vm14, %vm2845_vm9  ;;  %v570_v53 = vpop.permute.xlu1 %569 }
  0xd7   :  { %vm2473_vm8 = vmand %vm597_vm1, %vm2428_vm12  ;;  %vm663_vm1 = vcmp.ne.s32.totalorder %v626_v32, %v2188_v42  ;;  %961 = vadd.xlane.f32.xlu1 %v1712_v35  ;;  %vm596_vm12 = vcmp.eq.s32.totalorder %v570_v53, %v2212_v58 }
  0xd8   :  { %vm2479_vm4 = vmand %vm594_vm10, %vm2454_vm2  ;;  %vm599_vm10 = vcmp.eq.s32.totalorder %v579_v8, %v2212_v58  ;;  %v1714_v44 = vsel %vm2473_vm8, 1.0, %v1938_v36  ;;  %vm2858_vm2 = vcmp.lt.s32.totalorder %v2188_v42, 16 }
  0xd9   :  { %v2851_v25 = vsel %vm2479_vm4, 4294967295, %v2850_v25  ;;  %v1711_v41 = vsel %vm2479_vm4, 1.0, %v1938_v36  ;;  %vm2488_vm14 = vmand %vm661_vm13, %vm2845_vm9 }
  0xda   :  { %959 = vadd.xlane.f32.xlu0 %v1711_v41  ;;  %vm2500_vm13 = vmand %vm599_vm10, %vm2463_vm3  ;;  %v576_v54 = vpop.permute.xlu1 %575 }
  0xdb   :  { %vm2506_vm9 = vmand %vm596_vm12, %vm2488_vm14  ;;  %965 = vadd.xlane.f32.xlu1 %v1714_v44  ;;  %vm598_vm12 = vcmp.eq.s32.totalorder %v576_v54, %v2212_v58  ;;  %v1716_v60 = vsel %vm2500_vm13, 1.0, %v1938_v36 }
  0xdc   :  { %v1713_v49 = vsel %vm2506_vm9, 1.0, %v1938_v36  ;;  %vm2515_vm4 = vmand %vm663_vm1, %vm2858_vm2  ;;  %vm24_vm2 = vcmask 7168   ;;  %vm2870_vm1 = vnez %v2795_v45 }
  0xdd   :  { %vm2525_vm10 = vmand %vm598_vm12, %vm2515_vm4  ;;  %41 = vst.msk [vmem:[#allocation4] sm:$0xff] %vm24_vm2, %v1938_v36  ;;  %vm2873_vm12 = vnez %v2791_v39 }
  0xde   :  { %963 = vadd.xlane.f32.xlu0 %v1713_v49  ;;  %v1715_v61 = vsel %vm2525_vm10, 1.0, %v1938_v36  ;;  %v1806_v62 = vpop.permute.xlu1 %1805  ;;  %25 = vst.msk [vmem:[#allocation3] sm:$0xff] %vm24_vm2, %v1938_v36  ;;  %26 = vst.msk [vmem:[#allocation3 + $0x8] sm:$0xff] %vm24_vm2, %v1938_v36 }
  0xdf   :  { %969 = vadd.xlane.f32.xlu1 %v1716_v60  ;;  %v1808_v58 = vunpack.i.h.bf16 %v1806_v62  ;;  %v1807_v63 = vunpack.i.l.bf16 %v1806_v62  ;;  %27 = vst.msk [vmem:[#allocation3 + $0x10] sm:$0xff] %vm24_vm2, %v1938_v36  ;;  %28 = vst.msk [vmem:[#allocation3 + $0x18] sm:$0xff] %vm24_vm2, %v1938_v36 }
  0xe0   :  { %29 = vst.msk [vmem:[#allocation3 + $0x20] sm:$0xff] %vm24_vm2, %v1938_v36  ;;  %30 = vst.msk [vmem:[#allocation3 + $0x28] sm:$0xff] %vm24_vm2, %v1938_v36 }
  0xe1   :  { %1639 = vst [vmem:[#allocation6 + $0x18] sm:$0xff] %v1808_v58  ;;  %1638 = vst [vmem:[#allocation6 + $0x10] sm:$0xff] %v1807_v63 }
  0xe2   :  { %967 = vadd.xlane.f32.xlu0 %v1715_v61  ;;  %v1816_v4 = vpop.permute.xlu1 %1815  ;;  %31 = vst.msk [vmem:[#allocation3 + $0x30] sm:$0xff] %vm24_vm2, %v1938_v36  ;;  %32 = vst.msk [vmem:[#allocation3 + $0x38] sm:$0xff] %vm24_vm2, %v1938_v36 }
  0xe3   :  { %v1818_v29 = vunpack.i.h.bf16 %v1816_v4  ;;  %v1817_v30 = vunpack.i.l.bf16 %v1816_v4  ;;  %33 = vst.msk [vmem:[#allocation3 + $0x40] sm:$0xff] %vm24_vm2, %v1938_v36  ;;  %34 = vst.msk [vmem:[#allocation3 + $0x48] sm:$0xff] %vm24_vm2, %v1938_v36 }
  0xe4   :  { %35 = vst.msk [vmem:[#allocation3 + $0x50] sm:$0xff] %vm24_vm2, %v1938_v36  ;;  %36 = vst.msk [vmem:[#allocation3 + $0x58] sm:$0xff] %vm24_vm2, %v1938_v36  ;;  %v891_v11 = vld [vmem:[#allocation4] sm:$0xff] }
  0xe5   :  { %1643 = vst [vmem:[#allocation6 + $0x38] sm:$0xff] %v1818_v29  ;;  %1642 = vst [vmem:[#allocation6 + $0x30] sm:$0xff] %v1817_v30 }
  0xe6   :  { %37 = vst.msk [vmem:[#allocation3 + $0x60] sm:$0xff] %vm24_vm2, %v1938_v36  ;;  %38 = vst.msk [vmem:[#allocation3 + $0x68] sm:$0xff] %vm24_vm2, %v1938_v36  ;;  %v798_v51 = vld [vmem:[#allocation3 + $0x18] sm:$0xff] }
  0xe7   :  { %39 = vst.msk [vmem:[#allocation3 + $0x70] sm:$0xff] %vm24_vm2, %v1938_v36  ;;  %40 = vst.msk [vmem:[#allocation3 + $0x78] sm:$0xff] %vm24_vm2, %v1938_v36 }
  0xe8   :  { %42 = vst.msk [vmem:[#allocation4 + $0x8] sm:$0xff] %vm24_vm2, %v1938_v36  ;;  %43 = vst.msk [vmem:[#allocation4 + $0x10] sm:$0xff] %vm24_vm2, %v1938_v36 }
  0xe9   :  { %44 = vst.msk [vmem:[#allocation4 + $0x18] sm:$0xff] %vm24_vm2, %v1938_v36  ;;  %45 = vst.msk [vmem:[#allocation4 + $0x20] sm:$0xff] %vm24_vm2, %v1938_v36 }
  0xea   :  { %46 = vst.msk [vmem:[#allocation4 + $0x28] sm:$0xff] %vm24_vm2, %v1938_v36  ;;  %47 = vst.msk [vmem:[#allocation4 + $0x30] sm:$0xff] %vm24_vm2, %v1938_v36 }
  0xeb   :  { %48 = vst.msk [vmem:[#allocation4 + $0x38] sm:$0xff] %vm24_vm2, %v1938_v36  ;;  %49 = vst.msk [vmem:[#allocation4 + $0x40] sm:$0xff] %vm24_vm2, %v1938_v36 }
  0xec   :  { %50 = vst.msk [vmem:[#allocation4 + $0x48] sm:$0xff] %vm24_vm2, %v1938_v36  ;;  %51 = vst.msk [vmem:[#allocation4 + $0x50] sm:$0xff] %vm24_vm2, %v1938_v36 }
  0xed   :  { %52 = vst.msk [vmem:[#allocation4 + $0x58] sm:$0xff] %vm24_vm2, %v1938_v36  ;;  %53 = vst.msk [vmem:[#allocation4 + $0x60] sm:$0xff] %vm24_vm2, %v1938_v36 }
  0xee   :  { %54 = vst.msk [vmem:[#allocation4 + $0x68] sm:$0xff] %vm24_vm2, %v1938_v36  ;;  %55 = vst.msk [vmem:[#allocation4 + $0x70] sm:$0xff] %vm24_vm2, %v1938_v36 }
  0xef   :  { %56 = vst.msk [vmem:[#allocation4 + $0x78] sm:$0xff] %vm24_vm2, %v1938_v36  ;;  %57 = vst.msk [vmem:[#allocation5] sm:$0xff] %vm24_vm2, %v1938_v36  ;;  %v893_v21 = vld [vmem:[#allocation4 + $0x10] sm:$0xff]  ;;  %v892_v35 = vld [vmem:[#allocation4 + $0x8] sm:$0xff] }
  0xf0   :  { %58 = vst.msk [vmem:[#allocation5 + $0x8] sm:$0xff] %vm24_vm2, %v1938_v36  ;;  %59 = vst.msk [vmem:[#allocation5 + $0x10] sm:$0xff] %vm24_vm2, %v1938_v36  ;;  %v895_v20 = vld [vmem:[#allocation4 + $0x20] sm:$0xff]  ;;  %v894_v52 = vld [vmem:[#allocation4 + $0x18] sm:$0xff] }
  0xf1   :  { %60 = vst.msk [vmem:[#allocation5 + $0x18] sm:$0xff] %vm24_vm2, %v1938_v36  ;;  %61 = vst.msk [vmem:[#allocation5 + $0x20] sm:$0xff] %vm24_vm2, %v1938_v36  ;;  %v897_v27 = vld [vmem:[#allocation4 + $0x30] sm:$0xff]  ;;  %v896_v62 = vld [vmem:[#allocation4 + $0x28] sm:$0xff] }
  0xf2   :  { %62 = vst.msk [vmem:[#allocation5 + $0x28] sm:$0xff] %vm24_vm2, %v1938_v36  ;;  %63 = vst.msk [vmem:[#allocation5 + $0x30] sm:$0xff] %vm24_vm2, %v1938_v36  ;;  %v899_v8 = vld [vmem:[#allocation4 + $0x40] sm:$0xff] }
  0xf3   :  { %64 = vst.msk [vmem:[#allocation5 + $0x38] sm:$0xff] %vm24_vm2, %v1938_v36  ;;  %65 = vst.msk [vmem:[#allocation5 + $0x40] sm:$0xff] %vm24_vm2, %v1938_v36  ;;  %v901_v54 = vld [vmem:[#allocation4 + $0x50] sm:$0xff] }
  0xf4   :  { %66 = vst.msk [vmem:[#allocation5 + $0x48] sm:$0xff] %vm24_vm2, %v1938_v36  ;;  %67 = vst.msk [vmem:[#allocation5 + $0x50] sm:$0xff] %vm24_vm2, %v1938_v36  ;;  %v903_v58 = vld [vmem:[#allocation4 + $0x60] sm:$0xff] }
  0xf5   :  { %68 = vst.msk [vmem:[#allocation5 + $0x58] sm:$0xff] %vm24_vm2, %v1938_v36  ;;  %69 = vst.msk [vmem:[#allocation5 + $0x60] sm:$0xff] %vm24_vm2, %v1938_v36 }
  0xf6   :  { %70 = vst.msk [vmem:[#allocation5 + $0x68] sm:$0xff] %vm24_vm2, %v1938_v36  ;;  %71 = vst.msk [vmem:[#allocation5 + $0x70] sm:$0xff] %vm24_vm2, %v1938_v36 }
  0xf7   :  { %72 = vst.msk [vmem:[#allocation5 + $0x78] sm:$0xff] %vm24_vm2, %v1938_v36 }
 0x143   :  { %v942_v32 = vpop.xlane.xlu1 %941 }
 0x144   :  { %v972_v41 = vadd.f32 %v942_v32, %v892_v35 }
 0x146   :  { %988 = vst.msk [vmem:[#allocation4 + $0x8] sm:$0xff] %vm24_vm2, %v972_v41  ;;  %v906_v41 = vld [vmem:[#allocation4 + $0x78] sm:$0xff] }
 0x14b   :  { %v946_v49 = vpop.xlane.xlu1 %945 }
 0x14c   :  { %v940_v12 = vpop.xlane.xlu0 %939  ;;  %v974_v56 = vadd.f32 %v946_v49, %v894_v52 }
 0x14d   :  { %v971_v13 = vadd.f32 %v940_v12, %v891_v11  ;;  %v898_v11 = vld [vmem:[#allocation4 + $0x38] sm:$0xff]  ;;  %v905_v12 = vld [vmem:[#allocation4 + $0x70] sm:$0xff] }
 0x14e   :  { %990 = vst.msk [vmem:[#allocation4 + $0x18] sm:$0xff] %vm24_vm2, %v974_v56 }
 0x14f   :  { %987 = vst.msk [vmem:[#allocation4] sm:$0xff] %vm24_vm2, %v971_v13 }
 0x150   :  { %v944_v37 = vpop.xlane.xlu0 %943 }
 0x151   :  { %v973_v19 = vadd.f32 %v944_v37, %v893_v21 }
 0x153   :  { %989 = vst.msk [vmem:[#allocation4 + $0x10] sm:$0xff] %vm24_vm2, %v973_v19  ;;  %v950_v61 = vpop.xlane.xlu1 %949 }
 0x154   :  { %v948_v1 = vpop.xlane.xlu0 %947  ;;  %v976_v63 = vadd.f32 %v950_v61, %v896_v62 }
 0x155   :  { %v975_v24 = vadd.f32 %v948_v1, %v895_v20  ;;  %v900_v20 = vld [vmem:[#allocation4 + $0x48] sm:$0xff] }
 0x156   :  { %992 = vst.msk [vmem:[#allocation4 + $0x28] sm:$0xff] %vm24_vm2, %v976_v63 }
 0x157   :  { %991 = vst.msk [vmem:[#allocation4 + $0x20] sm:$0xff] %vm24_vm2, %v975_v24  ;;  %v902_v24 = vld [vmem:[#allocation4 + $0x58] sm:$0xff] }
 0x158   :  { %v952_v31 = vpop.xlane.xlu0 %951 }
 0x159   :  { %v977_v47 = vadd.f32 %v952_v31, %v897_v27 }
 0x15b   :  { %993 = vst.msk [vmem:[#allocation4 + $0x30] sm:$0xff] %vm24_vm2, %v977_v47  ;;  %v904_v47 = vld [vmem:[#allocation4 + $0x68] sm:$0xff] }
 0x15c   :  { %v954_v30 = vpop.xlane.xlu1 %953 }
 0x15d   :  { %v978_v13 = vadd.f32 %v954_v30, %v898_v11 }
 0x15f   :  { %994 = vst.msk [vmem:[#allocation4 + $0x38] sm:$0xff] %vm24_vm2, %v978_v13 }
 0x160   :  { %v958_v19 = vpop.xlane.xlu1 %957 }
 0x161   :  { %v980_v1 = vadd.f32 %v958_v19, %v900_v20 }
 0x162   :  { %v956_v53 = vpop.xlane.xlu0 %955 }
 0x163   :  { %v979_v44 = vadd.f32 %v956_v53, %v899_v8  ;;  %996 = vst.msk [vmem:[#allocation4 + $0x48] sm:$0xff] %vm24_vm2, %v980_v1 }
 0x164   :  { %v962_v27 = vpop.xlane.xlu1 %961 }
 0x165   :  { %995 = vst.msk [vmem:[#allocation4 + $0x40] sm:$0xff] %vm24_vm2, %v979_v44  ;;  %v982_v31 = vadd.f32 %v962_v27, %v902_v24 }
 0x167   :  { %v960_v57 = vpop.xlane.xlu0 %959  ;;  %998 = vst.msk [vmem:[#allocation4 + $0x58] sm:$0xff] %vm24_vm2, %v982_v31 }
 0x168   :  { %v981_v60 = vadd.f32 %v960_v57, %v901_v54  ;;  %v966_v32 = vpop.xlane.xlu1 %965 }
 0x169   :  { %v984_v35 = vadd.f32 %v966_v32, %v904_v47 }
 0x16a   :  { %997 = vst.msk [vmem:[#allocation4 + $0x50] sm:$0xff] %vm24_vm2, %v981_v60 }
 0x16b   :  { %v964_v4 = vpop.xlane.xlu0 %963  ;;  %1000 = vst.msk [vmem:[#allocation4 + $0x68] sm:$0xff] %vm24_vm2, %v984_v35 }
 0x16c   :  { %v983_v29 = vadd.f32 %v964_v4, %v903_v58  ;;  %v970_v8 = vpop.xlane.xlu1 %969 }
 0x16d   :  { %v986_v53 = vadd.f32 %v970_v8, %v906_v41 }
 0x16e   :  { %999 = vst.msk [vmem:[#allocation4 + $0x60] sm:$0xff] %vm24_vm2, %v983_v29 }
 0x16f   :  { %v968_v21 = vpop.xlane.xlu0 %967  ;;  %1002 = vst.msk [vmem:[#allocation4 + $0x78] sm:$0xff] %vm24_vm2, %v986_v53 }
 0x170   :  { %v985_v37 = vadd.f32 %v968_v21, %v905_v12 }
 0x172   :  { %1001 = vst.msk [vmem:[#allocation4 + $0x70] sm:$0xff] %vm24_vm2, %v985_v37 }
 0x183   :  { %v1775_v44 = vpop.f32.mrb[0].mxu1 }
 0x184   :  { %v1763_v49 = vpop.f32.mrb[0].mxu0  ;;  %v1693_v52 = vadd.f32 -10.0, %v1775_v44  ;;  %v428_v54 = vpop.f32.mrb[1].mxu1 }
 0x185   :  { %v1685_v56 = vadd.f32 -10.0, %v1763_v49  ;;  %v388_v57 = vpop.f32.mrb[1].mxu0  ;;  %v2646_v62 = vadd.f32 -10.0, %v428_v54 }
 0x186   :  { %v1684_v60 = vadd.f32 -10.0, %v388_v57  ;;  %v820_v61 = vsel %vm2402_vm0, %v1693_v52, 0.0  ;;  %v501_v47 = vmul.f32 1.442695, %v1693_v52  ;;  %vm2866_vm0 = vnez %v2807_v50 }
 0x187   :  { %845 = vadd.xlane.f32.xlu1 %v820_v61  ;;  %v812_v58 = vsel %vm2222_vm5, %v1685_v56, 0.0  ;;  %v819_v29 = vsel %vm2445_vm7, %v2646_v62, 0.0  ;;  %v485_v21 = vmul.f32 1.442695, %v1685_v56  ;;  %vm2863_vm5 = vnez %v2799_v33 }
 0x188   :  { %829 = vadd.xlane.f32.xlu0 %v812_v58  ;;  %v811_v63 = vsel %vm2298_vm6, %v1684_v60, 0.0  ;;  %vm2864_vm6 = vnez %v2851_v25  ;;  %v483_v8 = vmul.f32 1.442695, %v1684_v60  ;;  %vm2868_vm7 = vnez %v2787_v17 }
 0x189   :  { %1873 = vpow2.f32 %v485_v21  ;;  %v499_v17 = vmul.f32 1.442695, %v2646_v62 }
 0x18a   :  { %1875 = vpow2.f32 %v501_v47 }
 0x18b   :  { %v1778_v4 = vpop.f32.mrb[2].mxu1  ;;  %827 = vadd.xlane.f32.xlu1 %v811_v63  ;;  %1877 = vpow2.f32 %v483_v8 }
 0x18c   :  { %v1766_v30 = vpop.f32.mrb[2].mxu0  ;;  %843 = vadd.xlane.f32.xlu0 %v819_v29  ;;  %v438_v15 = vpop.f32.mrb[3].mxu1  ;;  %v1695_v37 = vadd.f32 -10.0, %v1778_v4  ;;  %1879 = vpow2.f32 %v499_v17 }
 0x18d   :  { %v1687_v11 = vadd.f32 -10.0, %v1766_v30  ;;  %v398_v12 = vpop.f32.mrb[3].mxu0  ;;  %v1694_v19 = vadd.f32 -10.0, %v438_v15 }
 0x18e   :  { %v1686_v13 = vadd.f32 -10.0, %v398_v12  ;;  %v822_v20 = vsel %vm2438_vm11, %v1695_v37, 0.0  ;;  %vm2867_vm11 = vnez %v2831_v0  ;;  %v505_v29 = vmul.f32 1.442695, %v1695_v37 }
 0x18f   :  { %v814_v9 = vsel %vm2277_vm15, %v1687_v11, 0.0  ;;  %v821_v27 = vsel %vm2864_vm6, %v1694_v19, 0.0  ;;  %vm2865_vm15 = vnez %v2810_v16  ;;  %v489_v0 = vmul.f32 1.442695, %v1687_v11 }
 0x190   :  { %833 = vadd.xlane.f32.xlu1 %v814_v9  ;;  %v813_v40 = vsel %vm2863_vm5, %v1686_v13, 0.0  ;;  %v487_v55 = vmul.f32 1.442695, %v1686_v13  ;;  %vm2875_vm5 = vnez %v2827_v14  ;;  %vm2876_vm6 = vnez %v2844_v28 }
 0x191   :  { %831 = vadd.xlane.f32.xlu0 %v813_v40  ;;  %1881 = vpow2.f32 %v489_v0 }
 0x192   :  { %1883 = vpow2.f32 %v487_v55 }
 0x193   :  { %v1781_v2 = vpop.f32.mrb[4].mxu1  ;;  %v1874_v16 = vpop.eup %1873  ;;  %1885 = vpow2.f32 %v505_v29  ;;  %v800_v29 = vld [vmem:[#allocation3 + $0x28] sm:$0xff] }
 0x194   :  { %v1769_v1 = vpop.f32.mrb[4].mxu0  ;;  %849 = vadd.xlane.f32.xlu1 %v822_v20  ;;  %v448_v24 = vpop.f32.mrb[5].mxu1  ;;  %v1697_v35 = vadd.f32 -10.0, %v1781_v2  ;;  %v699_v38 = vsel %vm2868_vm7, %v1874_v16, 0.0  ;;  %vm2880_vm7 = vnez %v2824_v10  ;;  %v795_v16 = vld [vmem:[#allocation3] sm:$0xff] }
 0x195   :  { %v1689_v31 = vadd.f32 -10.0, %v1769_v1  ;;  %v408_v6 = vpop.f32.mrb[5].mxu0  ;;  %847 = vadd.xlane.f32.xlu0 %v821_v27  ;;  %v1696_v41 = vadd.f32 -10.0, %v448_v24  ;;  %v1876_v61 = vpop.eup %1875 }
 0x196   :  { %v1688_v32 = vadd.f32 -10.0, %v408_v6  ;;  %v824_v25 = vsel %vm2473_vm8, %v1697_v35, 0.0  ;;  %vm2869_vm8 = vnez %v2817_v3  ;;  %v1878_v58 = vpop.eup %1877  ;;  %v503_v3 = vmul.f32 1.442695, %v1694_v19 }
 0x197   :  { %v816_v33 = vsel %vm2865_vm15, %v1689_v31, 0.0  ;;  %v823_v52 = vsel %vm2506_vm9, %v1696_v41, 0.0  ;;  %v707_v46 = vsel %vm2869_vm8, %v1876_v61, 0.0  ;;  %v698_v63 = vsel %vm2870_vm1, %v1878_v58, 0.0  ;;  %v1880_v11 = vpop.eup %1879  ;;  %v806_v58 = vld [vmem:[#allocation3 + $0x58] sm:$0xff] }
 0x198   :  { %837 = vadd.xlane.f32.xlu1 %v816_v33  ;;  %v815_v26 = vsel %vm2866_vm0, %v1688_v32, 0.0  ;;  %v493_v15 = vmul.f32 1.442695, %v1689_v31  ;;  %1887 = vpow2.f32 %v503_v3  ;;  %v491_v12 = vmul.f32 1.442695, %v1688_v32  ;;  %v799_v3 = vld [vmem:[#allocation3 + $0x20] sm:$0xff] }
 0x199   :  { %835 = vadd.xlane.f32.xlu0 %v815_v26  ;;  %v509_v13 = vmul.f32 1.442695, %v1697_v35  ;;  %v507_v21 = vmul.f32 1.442695, %v1696_v41  ;;  %vm2872_vm9 = vnez %v2834_v18  ;;  %vm2877_vm15 = vnez %v2805_v48 }
 0x19a   :  { %1889 = vpow2.f32 %v493_v15  ;;  %v706_v9 = vsel %vm2872_vm9, %v1880_v11, 0.0  ;;  %vm2878_vm0 = vnez %v2803_v43  ;;  %vm2881_vm8 = vnez %v2814_v59  ;;  %v803_v59 = vld [vmem:[#allocation3 + $0x40] sm:$0xff] }
 0x19b   :  { %v1784_v53 = vpop.f32.mrb[6].mxu1  ;;  %1891 = vpow2.f32 %v491_v12  ;;  %v1882_v37 = vpop.eup %1881  ;;  %v807_v11 = vld [vmem:[#allocation3 + $0x60] sm:$0xff] }
 0x19c   :  { %v1772_v44 = vpop.f32.mrb[6].mxu0  ;;  %853 = vadd.xlane.f32.xlu1 %v824_v25  ;;  %v458_v49 = vpop.f32.mrb[7].mxu1  ;;  %v1699_v50 = vadd.f32 -10.0, %v1784_v53  ;;  %1893 = vpow2.f32 %v509_v13  ;;  %v701_v42 = vsel %vm2873_vm12, %v1882_v37, 0.0  ;;  %v804_v53 = vld [vmem:[#allocation3 + $0x48] sm:$0xff] }
 0x19d   :  { %v1691_v54 = vadd.f32 -10.0, %v1772_v44  ;;  %v418_v56 = vpop.f32.mrb[7].mxu0  ;;  %851 = vadd.xlane.f32.xlu0 %v823_v52  ;;  %v1698_v30 = vadd.f32 -10.0, %v458_v49  ;;  %1895 = vpow2.f32 %v507_v21  ;;  %v796_v25 = vld [vmem:[#allocation3 + $0x8] sm:$0xff] }
 0x19e   :  { %v826_v60 = vsel %vm2500_vm13, %v1699_v50, 0.0  ;;  %v1690_v4 = vadd.f32 -10.0, %v418_v56  ;;  %vm2871_vm13 = vnez %v2820_v5  ;;  %v1884_v5 = vpop.eup %1883  ;;  %v513_v24 = vmul.f32 1.442695, %v1699_v50 }
 0x19f   :  { %v818_v57 = vsel %vm2867_vm11, %v1691_v54, 0.0  ;;  %v825_v62 = vsel %vm2525_vm10, %v1698_v30, 0.0  ;;  %v497_v19 = vmul.f32 1.442695, %v1691_v54  ;;  %v1886_v2 = vpop.eup %1885  ;;  %vm2874_vm10 = vnez %v2793_v22 }
 0x1a0   :  { %841 = vadd.xlane.f32.xlu1 %v818_v57  ;;  %v817_v45 = vsel %vm2871_vm13, %v1690_v4, 0.0  ;;  %v495_v40 = vmul.f32 1.442695, %v1690_v4  ;;  %v700_v20 = vsel %vm2874_vm10, %v1884_v5, 0.0  ;;  %v511_v18 = vmul.f32 1.442695, %v1698_v30 }
 0x1a1   :  { %716 = vadd.xlane.f32.xlu0 %v699_v38  ;;  %1897 = vpow2.f32 %v497_v19  ;;  %v709_v27 = vsel %vm2875_vm5, %v1886_v2, 0.0  ;;  %vm2879_vm11 = vnez %v2837_v23  ;;  %v797_v57 = vld [vmem:[#allocation3 + $0x10] sm:$0xff]  ;;  %v802_v5 = vld [vmem:[#allocation3 + $0x38] sm:$0xff]  ;;  %v683_v19 = vld [vmem:[#allocation5 + $0x8] sm:$0xff] }
 0x1a2   :  { %v1888_v1 = vpop.eup %1887  ;;  %1899 = vpow2.f32 %v495_v40 }
 0x1a3   :  { %v708_v39 = vsel %vm2876_vm6, %v1888_v1, 0.0  ;;  %1901 = vpow2.f32 %v513_v24  ;;  %v810_v1 = vld [vmem:[#allocation3 + $0x78] sm:$0xff] }
 0x1a4   :  { %857 = vadd.xlane.f32.xlu1 %v826_v60  ;;  %v1890_v31 = vpop.eup %1889  ;;  %1903 = vpow2.f32 %v511_v18 }
 0x1a5   :  { %v1892_v6 = vpop.eup %1891  ;;  %v703_v22 = vsel %vm2877_vm15, %v1890_v31, 0.0 }
 0x1a6   :  { %v1894_v47 = vpop.eup %1893  ;;  %v702_v32 = vsel %vm2878_vm0, %v1892_v6, 0.0 }
 0x1a7   :  { %v1896_v35 = vpop.eup %1895  ;;  %v711_v14 = vsel %vm2879_vm11, %v1894_v47, 0.0 }
 0x1a8   :  { %732 = vadd.xlane.f32.xlu1 %v707_v46  ;;  %v710_v28 = vsel %vm2488_vm14, %v1896_v35, 0.0  ;;  %v1299_v35 = vld [vmem:[#allocation4 + $0x8] sm:$0xff] }
 0x1ab   :  { %v1898_v33 = vpop.eup %1897 }
 0x1ac   :  { %714 = vadd.xlane.f32.xlu1 %v698_v63  ;;  %v1900_v41 = vpop.eup %1899  ;;  %v705_v48 = vsel %vm2880_vm7, %v1898_v33, 0.0  ;;  %v805_v63 = vld [vmem:[#allocation3 + $0x50] sm:$0xff] }
 0x1ad   :  { %v1902_v26 = vpop.eup %1901  ;;  %v704_v43 = vsel %vm2881_vm8, %v1900_v41, 0.0 }
 0x1ae   :  { %v1904_v8 = vpop.eup %1903  ;;  %v713_v23 = vsel %vm2463_vm3, %v1902_v26, 0.0 }
 0x1af   :  { %v712_v7 = vsel %vm2515_vm4, %v1904_v8, 0.0  ;;  %vm1315_vm4 = vcmp.lt.f32.partialorder %v1299_v35, 1e-06 }
 0x1b0   :  { %v1331_v8 = vsel %vm1315_vm4, 1.0, %v1299_v35 }
 0x1b7   :  { %1820 = vperm.xlu0 %1802, %v1938_v36  }
 0x1bd   :  { %1825 = vperm.xlu1 %1803, %v1938_v36  }
 0x1d6   :  { %839 = vadd.xlane.f32.xlu0 %v817_v45 }
 0x1da   :  { %855 = vadd.xlane.f32.xlu0 %v825_v62  ;;  %v808_v62 = vld [vmem:[#allocation3 + $0x68] sm:$0xff] }
 0x1de   :  { %730 = vadd.xlane.f32.xlu0 %v706_v9 }
 0x1e1   :  { %720 = vadd.xlane.f32.xlu1 %v701_v42 }
 0x1e2   :  { %718 = vadd.xlane.f32.xlu0 %v700_v20 }
 0x1e5   :  { %736 = vadd.xlane.f32.xlu1 %v709_v27  ;;  %v691_v27 = vld [vmem:[#allocation5 + $0x48] sm:$0xff] }
 0x1e6   :  { %734 = vadd.xlane.f32.xlu0 %v708_v39 }
 0x1e9   :  { %724 = vadd.xlane.f32.xlu1 %v703_v22 }
 0x1ea   :  { %722 = vadd.xlane.f32.xlu0 %v702_v32  ;;  %v682_v32 = vld [vmem:[#allocation5] sm:$0xff] }
 0x1ed   :  { %740 = vadd.xlane.f32.xlu1 %v711_v14 }
 0x1ee   :  { %738 = vadd.xlane.f32.xlu0 %v710_v28 }
 0x1f1   :  { %728 = vadd.xlane.f32.xlu1 %v705_v48 }
 0x1f2   :  { %726 = vadd.xlane.f32.xlu0 %v704_v43 }
 0x1f5   :  { %744 = vadd.xlane.f32.xlu1 %v713_v23  ;;  %v1298_v23 = vld [vmem:[#allocation4] sm:$0xff] }
 0x1f6   :  { %742 = vadd.xlane.f32.xlu0 %v712_v7  ;;  %vm1314_vm3 = vcmp.lt.f32.partialorder %v1298_v23, 1e-06 }
 0x214   :  { %v846_v44 = vpop.xlane.xlu1 %845 }
 0x215   :  { %v868_v10 = vadd.f32 %v846_v44, %v804_v53  ;;  %v830_v49 = vpop.xlane.xlu0 %829 }
 0x216   :  { %v860_v52 = vadd.f32 %v830_v49, %v796_v25 }
 0x217   :  { %884 = vst.msk [vmem:[#allocation3 + $0x48] sm:$0xff] %vm24_vm2, %v868_v10 }
 0x218   :  { %876 = vst.msk [vmem:[#allocation3 + $0x8] sm:$0xff] %vm24_vm2, %v860_v52  ;;  %v828_v54 = vpop.xlane.xlu1 %827  ;;  %v1330_v52 = vsel %vm1314_vm3, 1.0, %v1298_v23 }
 0x219   :  { %v859_v34 = vadd.f32 %v828_v54, %v795_v16  ;;  %v844_v56 = vpop.xlane.xlu0 %843 }
 0x21a   :  { %v867_v50 = vadd.f32 %v844_v56, %v803_v59 }
 0x21b   :  { %875 = vst.msk [vmem:[#allocation3] sm:$0xff] %vm24_vm2, %v859_v34 }
 0x21c   :  { %883 = vst.msk [vmem:[#allocation3 + $0x40] sm:$0xff] %vm24_vm2, %v867_v50 }
 0x21d   :  { %v834_v38 = vpop.xlane.xlu1 %833 }
 0x21e   :  { %v862_v60 = vadd.f32 %v834_v38, %v798_v51  ;;  %v832_v61 = vpop.xlane.xlu0 %831 }
 0x21f   :  { %v861_v46 = vadd.f32 %v832_v61, %v797_v57  ;;  %v1347_v49 = vld [vmem:[#allocation3 + $0x8] sm:$0xff]  ;;  %v801_v61 = vld [vmem:[#allocation3 + $0x30] sm:$0xff] }
 0x220   :  { %878 = vst.msk [vmem:[#allocation3 + $0x18] sm:$0xff] %vm24_vm2, %v862_v60 }
 0x221   :  { %877 = vst.msk [vmem:[#allocation3 + $0x10] sm:$0xff] %vm24_vm2, %v861_v46  ;;  %v850_v17 = vpop.xlane.xlu1 %849 }
 0x222   :  { %v870_v0 = vadd.f32 %v850_v17, %v806_v58  ;;  %v848_v55 = vpop.xlane.xlu0 %847  ;;  %v1346_v51 = vld [vmem:[#allocation3] sm:$0xff] }
 0x223   :  { %v869_v4 = vadd.f32 %v848_v55, %v805_v63  ;;  %v809_v63 = vld [vmem:[#allocation3 + $0x70] sm:$0xff]  ;;  %v690_v55 = vld [vmem:[#allocation5 + $0x40] sm:$0xff] }
 0x224   :  { %886 = vst.msk [vmem:[#allocation3 + $0x58] sm:$0xff] %vm24_vm2, %v870_v0 }
 0x225   :  { %885 = vst.msk [vmem:[#allocation3 + $0x50] sm:$0xff] %vm24_vm2, %v869_v4  ;;  %v838_v30 = vpop.xlane.xlu1 %837 }
 0x226   :  { %v864_v45 = vadd.f32 %v838_v30, %v800_v29  ;;  %v836_v15 = vpop.xlane.xlu0 %835  ;;  %v684_v30 = vld [vmem:[#allocation5 + $0x10] sm:$0xff] }
 0x227   :  { %v863_v12 = vadd.f32 %v836_v15, %v799_v3  ;;  %v685_v3 = vld [vmem:[#allocation5 + $0x18] sm:$0xff] }
 0x228   :  { %880 = vst.msk [vmem:[#allocation3 + $0x28] sm:$0xff] %vm24_vm2, %v864_v45 }
 0x229   :  { %879 = vst.msk [vmem:[#allocation3 + $0x20] sm:$0xff] %vm24_vm2, %v863_v12  ;;  %v854_v13 = vpop.xlane.xlu1 %853 }
 0x22a   :  { %v872_v21 = vadd.f32 %v854_v13, %v808_v62  ;;  %v852_v37 = vpop.xlane.xlu0 %851  ;;  %v693_v62 = vld [vmem:[#allocation5 + $0x58] sm:$0xff] }
 0x22b   :  { %v871_v9 = vadd.f32 %v852_v37, %v807_v11  ;;  %v692_v11 = vld [vmem:[#allocation5 + $0x50] sm:$0xff] }
 0x22c   :  { %888 = vst.msk [vmem:[#allocation3 + $0x68] sm:$0xff] %vm24_vm2, %v872_v21 }
 0x22d   :  { %887 = vst.msk [vmem:[#allocation3 + $0x60] sm:$0xff] %vm24_vm2, %v871_v9  ;;  %v842_v40 = vpop.xlane.xlu1 %841 }
 0x22e   :  { %v866_v42 = vadd.f32 %v842_v40, %v802_v5  ;;  %v717_v2 = vpop.xlane.xlu0 %716  ;;  %v687_v5 = vld [vmem:[#allocation5 + $0x28] sm:$0xff] }
 0x22f   :  { %v747_v20 = vadd.f32 %v717_v2, %v683_v19  ;;  %v686_v19 = vld [vmem:[#allocation5 + $0x20] sm:$0xff] }
 0x230   :  { %882 = vst.msk [vmem:[#allocation3 + $0x38] sm:$0xff] %vm24_vm2, %v866_v42 }
 0x231   :  { %764 = vst.msk [vmem:[#allocation5 + $0x8] sm:$0xff] %vm24_vm2, %v747_v20  ;;  %v858_v24 = vpop.xlane.xlu1 %857 }
 0x232   :  { %v874_v18 = vadd.f32 %v858_v24, %v810_v1  ;;  %v695_v1 = vld [vmem:[#allocation5 + $0x68] sm:$0xff]  ;;  %v694_v24 = vld [vmem:[#allocation5 + $0x60] sm:$0xff] }
 0x234   :  { %890 = vst.msk [vmem:[#allocation3 + $0x78] sm:$0xff] %vm24_vm2, %v874_v18 }
 0x235   :  { %v733_v31 = vpop.xlane.xlu1 %732 }
 0x236   :  { %v755_v39 = vadd.f32 %v733_v31, %v691_v27  ;;  %v1821_v6 = vpop.permute.xlu0 %1820 }
 0x237   :  { %v1823_v22 = vunpack.i.h.bf16 %v1821_v6  ;;  %v1822_v47 = vunpack.i.l.bf16 %v1821_v6  ;;  %v689_v6 = vld [vmem:[#allocation5 + $0x38] sm:$0xff] }
 0x238   :  { %772 = vst.msk [vmem:[#allocation5 + $0x48] sm:$0xff] %vm24_vm2, %v755_v39  ;;  %v1363_v14 = vld [vmem:[#allocation5 + $0x8] sm:$0xff] }
 0x239   :  { %1645 = vst [vmem:[#allocation6 + $0x48] sm:$0xff] %v1823_v22  ;;  %1644 = vst [vmem:[#allocation6 + $0x40] sm:$0xff] %v1822_v47  ;;  %v715_v33 = vpop.xlane.xlu1 %714  ;;  %v1379_v28 = vmax.f32 %v1363_v14, 1e-30  ;;  %v688_v22 = vld [vmem:[#allocation5 + $0x30] sm:$0xff] }
 0x23a   :  { %v746_v41 = vadd.f32 %v715_v33, %v682_v32  ;;  %v697_v33 = vld [vmem:[#allocation5 + $0x78] sm:$0xff] }
 0x23b   :  { %1905 = vlog2.f32 %v1379_v28  ;;  %v696_v28 = vld [vmem:[#allocation5 + $0x70] sm:$0xff] }
 0x23c   :  { %763 = vst.msk [vmem:[#allocation5] sm:$0xff] %vm24_vm2, %v746_v41  ;;  %1907 = vrcp.f32 %v1331_v8 }
 0x23d   :  { %v1826_v48 = vpop.permute.xlu1 %1825 }
 0x23e   :  { %v1828_v26 = vunpack.i.h.bf16 %v1826_v48  ;;  %v1827_v43 = vunpack.i.l.bf16 %v1826_v48 }
 0x240   :  { %1647 = vst [vmem:[#allocation6 + $0x58] sm:$0xff] %v1828_v26  ;;  %1646 = vst [vmem:[#allocation6 + $0x50] sm:$0xff] %v1827_v43 }
 0x243   :  { %v1362_v7 = vld [vmem:[#allocation5] sm:$0xff] }
 0x244   :  { %v1378_v53 = vmax.f32 %v1362_v7, 1e-30 }
 0x245   :  { %v1906_v25 = vpop.eup %1905 }
 0x246   :  { %v1397_v44 = vmul.f32 0.6931472, %v1906_v25  ;;  %1909 = vlog2.f32 %v1378_v53  ;;  %v1908_v59 = vpop.eup %1907 }
 0x247   :  { %1911 = vrcp.f32 %v1330_v52 }
 0x248   :  { %v1427_v10 = vmul.f32 %v1397_v44, %v1299_v35 }
 0x24a   :  { %v1443_v16 = vsub.f32 %v1347_v49, %v1427_v10 }
 0x24c   :  { %v1461_v54 = vmul.f32 %v1908_v59, %v1443_v16 }
 0x24e   :  { %1563 = vperm.xlu1 %1803, %v1461_v54  }
 0x250   :  { %v1910_v34 = vpop.eup %1909 }
 0x251   :  { %v1395_v56 = vmul.f32 0.6931472, %v1910_v34  ;;  %v1912_v38 = vpop.eup %1911 }
 0x252   :  { %1835 = vperm.xlu1 %1803, %v1938_v36  }
 0x253   :  { %v1426_v50 = vmul.f32 %v1395_v56, %v1298_v23 }
 0x255   :  { %v1442_v57 = vsub.f32 %v1346_v51, %v1426_v50 }
 0x257   :  { %v1459_v60 = vmul.f32 %v1912_v38, %v1442_v57 }
 0x259   :  { %1558 = vperm.xlu0 %1802, %v1459_v60  }
 0x25d   :  { %1830 = vperm.xlu0 %1802, %v1938_v36  }
 0x263   :  { %v840_v46 = vpop.xlane.xlu0 %839 }
 0x264   :  { %v865_v58 = vadd.f32 %v840_v46, %v801_v61 }
 0x266   :  { %881 = vst.msk [vmem:[#allocation3 + $0x30] sm:$0xff] %vm24_vm2, %v865_v58 }
 0x267   :  { %v856_v17 = vpop.xlane.xlu0 %855 }
 0x268   :  { %v873_v0 = vadd.f32 %v856_v17, %v809_v63 }
 0x26a   :  { %889 = vst.msk [vmem:[#allocation3 + $0x70] sm:$0xff] %vm24_vm2, %v873_v0 }
 0x26b   :  { %v731_v4 = vpop.xlane.xlu0 %730 }
 0x26c   :  { %v754_v29 = vadd.f32 %v731_v4, %v690_v55 }
 0x26e   :  { %771 = vst.msk [vmem:[#allocation5 + $0x40] sm:$0xff] %vm24_vm2, %v754_v29  ;;  %v721_v45 = vpop.xlane.xlu1 %720 }
 0x26f   :  { %v749_v15 = vadd.f32 %v721_v45, %v685_v3  ;;  %v719_v36 = vpop.xlane.xlu0 %718 }
 0x270   :  { %v748_v12 = vadd.f32 %v719_v36, %v684_v30 }
 0x271   :  { %766 = vst.msk [vmem:[#allocation5 + $0x18] sm:$0xff] %vm24_vm2, %v749_v15 }
 0x272   :  { %765 = vst.msk [vmem:[#allocation5 + $0x10] sm:$0xff] %vm24_vm2, %v748_v12  ;;  %v737_v13 = vpop.xlane.xlu1 %736 }
 0x273   :  { %v757_v21 = vadd.f32 %v737_v13, %v693_v62  ;;  %v735_v37 = vpop.xlane.xlu0 %734 }
 0x274   :  { %v756_v9 = vadd.f32 %v735_v37, %v692_v11 }
 0x275   :  { %774 = vst.msk [vmem:[#allocation5 + $0x58] sm:$0xff] %vm24_vm2, %v757_v21 }
 0x276   :  { %773 = vst.msk [vmem:[#allocation5 + $0x50] sm:$0xff] %vm24_vm2, %v756_v9  ;;  %v725_v40 = vpop.xlane.xlu1 %724 }
 0x277   :  { %v751_v42 = vadd.f32 %v725_v40, %v687_v5  ;;  %v723_v2 = vpop.xlane.xlu0 %722 }
 0x278   :  { %v750_v20 = vadd.f32 %v723_v2, %v686_v19 }
 0x279   :  { %768 = vst.msk [vmem:[#allocation5 + $0x28] sm:$0xff] %vm24_vm2, %v751_v42 }
 0x27a   :  { %767 = vst.msk [vmem:[#allocation5 + $0x20] sm:$0xff] %vm24_vm2, %v750_v20  ;;  %v741_v18 = vpop.xlane.xlu1 %740 }
 0x27b   :  { %v759_v27 = vadd.f32 %v741_v18, %v695_v1  ;;  %v739_v31 = vpop.xlane.xlu0 %738 }
 0x27c   :  { %v758_v39 = vadd.f32 %v739_v31, %v694_v24 }
 0x27d   :  { %776 = vst.msk [vmem:[#allocation5 + $0x68] sm:$0xff] %vm24_vm2, %v759_v27 }
 0x27e   :  { %775 = vst.msk [vmem:[#allocation5 + $0x60] sm:$0xff] %vm24_vm2, %v758_v39  ;;  %v729_v47 = vpop.xlane.xlu1 %728 }
 0x27f   :  { %v753_v32 = vadd.f32 %v729_v47, %v689_v6  ;;  %v727_v35 = vpop.xlane.xlu0 %726 }
 0x280   :  { %v752_v14 = vadd.f32 %v727_v35, %v688_v22 }
 0x281   :  { %770 = vst.msk [vmem:[#allocation5 + $0x38] sm:$0xff] %vm24_vm2, %v753_v32 }
 0x282   :  { %769 = vst.msk [vmem:[#allocation5 + $0x30] sm:$0xff] %vm24_vm2, %v752_v14  ;;  %v745_v41 = vpop.xlane.xlu1 %744 }
 0x283   :  { %v761_v48 = vadd.f32 %v745_v41, %v697_v33  ;;  %v743_v26 = vpop.xlane.xlu0 %742 }
 0x284   :  { %v760_v43 = vadd.f32 %v743_v26, %v696_v28 }
 0x285   :  { %778 = vst.msk [vmem:[#allocation5 + $0x78] sm:$0xff] %vm24_vm2, %v761_v48 }
 0x286   :  { %777 = vst.msk [vmem:[#allocation5 + $0x70] sm:$0xff] %vm24_vm2, %v760_v43 }
 0x2cd   :  { %v1564_v8 = vpop.permute.xlu1 %1563 }
 0x2ce   :  { %1637 = vst [vmem:[#allocation6 + $0x8] sm:$0xff] %v1564_v8 }
 0x2d1   :  { %v1836_v23 = vpop.permute.xlu1 %1835 }
 0x2d2   :  { %v1838_v7 = vunpack.i.h.bf16 %v1836_v23  ;;  %v1837_v53 = vunpack.i.l.bf16 %v1836_v23 }
 0x2d4   :  { %1651 = vst [vmem:[#allocation6 + $0x78] sm:$0xff] %v1838_v7  ;;  %1650 = vst [vmem:[#allocation6 + $0x70] sm:$0xff] %v1837_v53 }
 0x2d8   :  { %v1559_v25 = vpop.permute.xlu0 %1558 }
 0x2d9   :  { %1636 = vst [vmem:[#allocation6] sm:$0xff] %v1559_v25 }
 0x2dc   :  { %v1831_v44 = vpop.permute.xlu0 %1830 }
 0x2dd   :  { %v1833_v10 = vunpack.i.h.bf16 %v1831_v44  ;;  %v1832_v49 = vunpack.i.l.bf16 %v1831_v44 }
 0x2df   :  { %1649 = vst [vmem:[#allocation6 + $0x68] sm:$0xff] %v1833_v10  ;;  %1648 = vst [vmem:[#allocation6 + $0x60] sm:$0xff] %v1832_v49 }
 0x2e0   :  { %1924 = shalt.err (!%p1921_p4)
}
 0x2e1   :  { %s1925_s10 = scalar_lea.hbm %s2764_s4, 2048 }
 0x2e2   :  { %p1926_p5 = scmp.ne.s32.totalorder %s2764_s4, %s1925_s10  ;;  %p1929_p6 = scmp.lt.u32.totalorder %s1925_s10, %s2764_s4 }
 0x2e4   :  { %p1931_p7 = pnand %p1929_p6, %p1926_p5 }
 0x2e6   :  { %1934 = shalt.err (!%p1931_p7)
}
 0x2e7   :  { %s1940_s15 = smov 128   ;;  %s1941_s16 = smov 8  }
 0x2e8   :  { %1663 = dma.vmem_to_hbm [thread:$0]  %s1658_s6, 2048, %s2764_s4, [#allocation7], %s1940_s15, %s1940_s15, %s1941_s16  }
 0x2e9   :  { %1935 = dma.done.wait [#allocation7], 2048  }
 0x2ea   :  { %1936 = vsyncadd [#allocation7], 4294965248 }
 0x2eb   :  { %1667 = vsyncpa [#allocation7], 1 }

</bundles_post_ra>
